<compile_context>
chip_gen: v7x
topology: tpu7x:2x2x1
jax: 0.10.0
libtpu: 0.0.40
codegen_flags: <defaults>
</compile_context>

<pallas_src>
import functools

import jax
import jax.numpy as jnp
from jax.experimental import pallas as pl
from jax.experimental.pallas import tpu as pltpu

LANE = 128  # lane-dense slab width (multiple of 128)


# ----------------------------------------------------------------------------
# Pallas kernels
# ----------------------------------------------------------------------------
def _sent_convs_kernel(x_ref, w3_ref, w4_ref, w5_ref, b_ref, cat_ref, o_ref):
    """Fused sentence Conv1d(k=3,4,5) + bias + ReLU + max-over-time.

    x_ref  : (TN, W, E)   word embeddings (bf16, channels-last)
    wK_ref : (K*E, LANE)  im2col conv weight, output band pre-placed, bf16
    b_ref  : (3, LANE)    per-conv bias rows (zero outside own band), f32
    cat_ref: (TN, LANE)   category embedding pre-placed in its band, f32
    o_ref  : (TN, LANE)   lane-dense sentence-feature slab, f32
    """
    x = x_ref[...].astype(jnp.float32)          # (TN, W, E)
    _, W, E = x.shape
    bias = b_ref[...]                           # (3, LANE)
    out = cat_ref[...]                          # (TN, LANE) start with category band

    for idx, w_ref in enumerate((w3_ref, w4_ref, w5_ref)):
        k = w_ref.shape[0] // E
        T = W - k + 1
        # im2col: (TN, T, k*E) -- contraction depth k*E instead of E
        xw = jnp.concatenate([x[:, dk:dk + T, :] for dk in range(k)], axis=2)
        acc = jax.lax.dot_general(
            xw.astype(jnp.bfloat16), w_ref[...],
            dimension_numbers=(((2,), (0,)), ((), ())),
            preferred_element_type=jnp.float32)          # (TN, T, LANE)
        acc = jnp.maximum(acc + bias[idx:idx + 1, :], 0.0)
        out = out + jnp.max(acc, axis=1)                 # disjoint bands -> add

    o_ref[...] = out


def _doc_conv_proj_kernel(s_ref, wd_ref, bd_ref, wp_ref, bp_ref, o_ref):
    """Doc-level Conv1d(k=3) + ReLU + max-pool + Linear projection.

    s_ref : (B, S, LANE)       sentence slab (3H feats + category + zero pad)
    wd_ref: (3*LANE, LANE)     im2col doc conv weight (bf16, padded rows/cols zero)
    bd_ref: (1, LANE)          doc conv bias (f32, zero beyond H)
    wp_ref: (LANE, LANE)       projection weight (bf16, padded rows/cols zero)
    bp_ref: (1, LANE)          projection bias (f32, zero beyond L)
    o_ref : (B, LANE)          lane-dense logits slab, f32
    """
    s = s_ref[...]                              # (B, S, LANE) f32
    _, S, D = s.shape
    K = wd_ref.shape[0] // D
    T = S - K + 1
    xw = jnp.concatenate([s[:, dk:dk + T, :] for dk in range(K)], axis=2)
    acc = jax.lax.dot_general(
        xw.astype(jnp.bfloat16), wd_ref[...],
        dimension_numbers=(((2,), (0,)), ((), ())),
        preferred_element_type=jnp.float32)              # (B, T, LANE)
    acc = jnp.maximum(acc + bd_ref[...], 0.0)
    pooled = jnp.max(acc, axis=1)                        # (B, LANE)
    logits = jax.lax.dot_general(
        pooled.astype(jnp.bfloat16), wp_ref[...],
        dimension_numbers=(((1,), (0,)), ((), ())),
        preferred_element_type=jnp.float32)
    o_ref[...] = logits + bp_ref[...]


# ----------------------------------------------------------------------------
# pallas_call wrappers
# ----------------------------------------------------------------------------
def _round_up(n, m):
    return ((n + m - 1) // m) * m


def sent_convs_fused(x_embed, cat_slab, w3, w4, w5, bias, *, tn=8):
    """x_embed: (N, W, E) bf16; cat_slab: (N, LANE) f32 -> (N, LANE) f32."""
    N, W, E = x_embed.shape
    n_pad = _round_up(max(N, tn), tn)
    if n_pad != N:
        x_embed = jnp.pad(x_embed, ((0, n_pad - N), (0, 0), (0, 0)))
        cat_slab = jnp.pad(cat_slab, ((0, n_pad - N), (0, 0)))
    grid = (n_pad // tn,)
    out = pl.pallas_call(
        _sent_convs_kernel,
        out_shape=jax.ShapeDtypeStruct((n_pad, LANE), jnp.float32),
        grid=grid,
        in_specs=[
            pl.BlockSpec((tn, W, E), lambda i: (i, 0, 0)),
            pl.BlockSpec(w3.shape, lambda i: (0, 0)),
            pl.BlockSpec(w4.shape, lambda i: (0, 0)),
            pl.BlockSpec(w5.shape, lambda i: (0, 0)),
            pl.BlockSpec(bias.shape, lambda i: (0, 0)),
            pl.BlockSpec((tn, LANE), lambda i: (i, 0)),
        ],
        out_specs=pl.BlockSpec((tn, LANE), lambda i: (i, 0)),
        compiler_params=pltpu.CompilerParams(
            dimension_semantics=("parallel",)),
    )(x_embed, w3, w4, w5, bias, cat_slab)
    return out[:N]


def doc_conv_proj(sent_slab, wd, bd, wp, bp):
    """sent_slab: (B, S, LANE) f32 -> lane-dense logits (B, LANE) f32."""
    B = sent_slab.shape[0]
    # Tiny single-block problem: no grid, whole arrays resident in VMEM.
    return pl.pallas_call(
        _doc_conv_proj_kernel,
        out_shape=jax.ShapeDtypeStruct((B, LANE), jnp.float32),
    )(sent_slab, wd, bd, wp, bp)


# ----------------------------------------------------------------------------
# Full forward pass (embedding gathers & reshapes are plain-JAX glue)
# ----------------------------------------------------------------------------
@functools.partial(jax.jit, static_argnames=("hidden_size", "label_size"))
def cnn_han_forward(params, x, sent_seq_len, word_seq_len, x_category, *,
                    hidden_size, label_size):
    # sent_seq_len / word_seq_len are accepted but unused (as in the torch code).
    del sent_seq_len, word_seq_len
    B, S, W = x.shape
    E = params["embedder"].shape[1]
    C = params["embedder_category"].shape[1]
    N = B * S
    H3 = 3 * hidden_size

    # word embedding lookup (frozen w2v table), gathered directly in bf16
    # TODO(synk): dropout layers are identity here (inference); no in-kernel RNG dropout.
    x_embed = jnp.take(params["embedder"], x.astype(jnp.int32), axis=0)
    x_embed = x_embed.reshape(N, W, E)                          # (N, W, E) bf16

    # category embedding lookup, pre-placed into its lane band of the slab
    cat = jnp.take(params["embedder_category"],
                   x_category.astype(jnp.int32), axis=0)
    cat = cat.reshape(N, C).astype(jnp.float32)
    cat_slab = jnp.pad(cat, ((0, 0), (H3, LANE - H3 - C)))      # (N, LANE)

    # fused sentence convs (k=3,4,5) + ReLU + max-pool (top_k=1) + category concat
    sent_slab = sent_convs_fused(
        x_embed, cat_slab,
        params["sent_conv_w3"], params["sent_conv_w4"], params["sent_conv_w5"],
        params["sent_conv_b"])                                  # (N, LANE)
    sent_slab = sent_slab.reshape(B, S, LANE)

    # fused doc-level conv(k=3) + ReLU + max-pool + projection
    logits_pad = doc_conv_proj(sent_slab,
                               params["doc_conv_w"], params["doc_conv_b"],
                               params["proj_w"], params["proj_b"])  # (B, LANE)
    return logits_pad[:, :label_size]


# ----------------------------------------------------------------------------
# Deterministic parameter construction (synthetic, no checkpoint)
# ----------------------------------------------------------------------------
def _pack_sent_conv_weight(w_hek, band_start):
    # torch Conv1d weight (H, E, K) -> im2col (K*E, LANE) bf16,
    # output columns placed at [band_start, band_start+H), zeros elsewhere.
    H, E, K = w_hek.shape
    w = jnp.transpose(w_hek, (2, 1, 0)).reshape(K * E, H)
    w = jnp.pad(w, ((0, 0), (band_start, LANE - band_start - H)))
    return w.astype(jnp.bfloat16)


def _pack_doc_conv_weight(w_hdk):
    # torch Conv1d weight (H, D, K) -> im2col (K*LANE, LANE) bf16,
    # rows for d >= D and columns >= H are zero.
    H, D, K = w_hdk.shape
    w = jnp.transpose(w_hdk, (2, 1, 0))                         # (K, D, H)
    w = jnp.pad(w, ((0, 0), (0, LANE - D), (0, LANE - H)))
    return w.reshape(K * LANE, LANE).astype(jnp.bfloat16)


def _pack_proj_weight(w_lh):
    # torch Linear weight (L, H) -> (LANE, LANE) bf16, zero padded.
    L, H = w_lh.shape
    w = jnp.transpose(w_lh, (1, 0))
    w = jnp.pad(w, ((0, LANE - H), (0, LANE - L)))
    return w.astype(jnp.bfloat16)


def init_params(key, vocab_size, label_size, emb_size, hidden_size,
                category_vocab, category_size):
    assert 3 * hidden_size + category_size <= LANE
    assert hidden_size <= LANE and label_size <= LANE
    keys = jax.random.split(key, 8)
    params = {}
    params["embedder"] = (0.1 * jax.random.normal(
        keys[0], (vocab_size, emb_size), jnp.float32)).astype(jnp.bfloat16)
    params["embedder_category"] = 0.1 * jax.random.normal(
        keys[1], (category_vocab, category_size), jnp.float32)

    bias_rows = []
    for i, k in enumerate((3, 4, 5)):
        w = 0.1 * jax.random.normal(keys[2 + i],
                                    (hidden_size, emb_size, k), jnp.float32)
        band = i * hidden_size
        params[f"sent_conv_w{k}"] = _pack_sent_conv_weight(w, band)
        b = 0.01 * jnp.ones((hidden_size,), jnp.float32)
        bias_rows.append(jnp.pad(b, (band, LANE - band - hidden_size)))
    params["sent_conv_b"] = jnp.stack(bias_rows, axis=0)        # (3, LANE) f32

    hidden_doc = 3 * hidden_size + category_size
    wd = 0.1 * jax.random.normal(keys[5], (hidden_size, hidden_doc, 3),
                                 jnp.float32)
    params["doc_conv_w"] = _pack_doc_conv_weight(wd)            # (3*LANE, LANE)
    params["doc_conv_b"] = jnp.pad(
        0.01 * jnp.ones((1, hidden_size), jnp.float32),
        ((0, 0), (0, LANE - hidden_size)))

    wp = 0.1 * jax.random.normal(keys[6], (label_size, hidden_size),
                                 jnp.float32)
    params["proj_w"] = _pack_proj_weight(wp)                    # (LANE, LANE)
    params["proj_b"] = jnp.pad(
        0.01 * jnp.ones((1, label_size), jnp.float32),
        ((0, 0), (0, LANE - label_size)))
    return params


if __name__ == "__main__":
    # small, forward-consistent shapes
    vocab_size = 50
    label_size = 5
    emb_size = 32
    hidden_size = 16          # num_kernels
    category_vocab = 16       # rows in emb_category table (padding_idx=14)
    category_size = 8
    B, S, W = 2, 6, 12

    key = jax.random.PRNGKey(0)
    kp, kx, kc = jax.random.split(key, 3)
    params = init_params(kp, vocab_size, label_size, emb_size, hidden_size,
                         category_vocab, category_size)

    x = jax.random.randint(kx, (B, S, W), 0, vocab_size, dtype=jnp.int32)
    x_category = jax.random.randint(kc, (B, S), 0, category_vocab,
                                    dtype=jnp.int32)
    sent_seq_len = jnp.full((B,), S, dtype=jnp.int32)        # unused in forward
    word_seq_len = jnp.full((B, S), W, dtype=jnp.int32)      # unused in forward

    logits = cnn_han_forward(params, x, sent_seq_len, word_seq_len, x_category,
                             hidden_size=hidden_size, label_size=label_size)
    jax.block_until_ready(logits)
    assert logits.shape == (B, label_size)
    print("KERNEL_OK")
</pallas_src>

<mosaic_0001>
module attributes {stable_mosaic.version = 11 : i64} {
  func.func @_doc_conv_proj_kernel(%arg0: memref<2x6x128xf32, #tpu.memory_space<vmem>>, %arg1: memref<384x128xbf16, #tpu.memory_space<vmem>>, %arg2: memref<1x128xf32, #tpu.memory_space<vmem>>, %arg3: memref<128x128xbf16, #tpu.memory_space<vmem>>, %arg4: memref<1x128xf32, #tpu.memory_space<vmem>>, %arg5: memref<2x128xf32, #tpu.memory_space<vmem>>) attributes {dimension_semantics = [], scalar_prefetch = 0 : i64, scratch_operands = 0 : i64, tpu.core_type = #tpu.core_type<tc>} {
    %c0 = arith.constant 0 : index
    %c0_0 = arith.constant 0 : index
    %c0_1 = arith.constant 0 : index
    %0 = vector.load %arg0[%c0, %c0_0, %c0_1] : memref<2x6x128xf32, #tpu.memory_space<vmem>>, vector<2x6x128xf32>
    %1 = vector.extract_strided_slice %0 {offsets = [0, 0, 0], sizes = [2, 4, 128], strides = [1, 1, 1]} : vector<2x6x128xf32> to vector<2x4x128xf32>
    %2 = vector.extract_strided_slice %0 {offsets = [0, 1, 0], sizes = [2, 4, 128], strides = [1, 1, 1]} : vector<2x6x128xf32> to vector<2x4x128xf32>
    %3 = vector.extract_strided_slice %0 {offsets = [0, 2, 0], sizes = [2, 4, 128], strides = [1, 1, 1]} : vector<2x6x128xf32> to vector<2x4x128xf32>
    %4 = tpu.concatenate %1, %2, %3 in 2 : vector<2x4x128xf32>, vector<2x4x128xf32>, vector<2x4x128xf32> -> vector<2x4x384xf32>
    %5 = arith.truncf %4 : vector<2x4x384xf32> to vector<2x4x384xbf16>
    %c0_2 = arith.constant 0 : index
    %c0_3 = arith.constant 0 : index
    %6 = vector.load %arg1[%c0_2, %c0_3] : memref<384x128xbf16, #tpu.memory_space<vmem>>, vector<384x128xbf16>
    %cst = arith.constant dense<0.000000e+00> : vector<2x4x128xf32>
    %7 = tpu.matmul %5, %6, %cst {dimension_numbers = #tpu.dot_dimension_numbers<[2], [0], [0, 1], [1], [0, 0, 0, 1, 1, 1], [], []>} : vector<2x4x384xbf16>, vector<384x128xbf16>, vector<2x4x128xf32> -> vector<2x4x128xf32>
    %c0_4 = arith.constant 0 : index
    %c0_5 = arith.constant 0 : index
    %8 = vector.load %arg2[%c0_4, %c0_5] : memref<1x128xf32, #tpu.memory_space<vmem>>, vector<1x128xf32>
    %9 = vector.shape_cast %8 : vector<1x128xf32> to vector<1x1x128xf32>
    %10 = vector.broadcast %9 : vector<1x1x128xf32> to vector<2x4x128xf32>
    %11 = arith.addf %7, %10 : vector<2x4x128xf32>
    %cst_6 = arith.constant 0.000000e+00 : f32
    %12 = vector.broadcast %cst_6 : f32 to vector<2x4x128xf32>
    %13 = arith.maximumf %11, %12 : vector<2x4x128xf32>
    %cst_7 = arith.constant dense<0xFF800000> : vector<2x128xf32>
    %14 = vector.multi_reduction <maximumf>, %13, %cst_7 [1] : vector<2x4x128xf32> to vector<2x128xf32>
    %15 = arith.truncf %14 : vector<2x128xf32> to vector<2x128xbf16>
    %c0_8 = arith.constant 0 : index
    %c0_9 = arith.constant 0 : index
    %16 = vector.load %arg3[%c0_8, %c0_9] : memref<128x128xbf16, #tpu.memory_space<vmem>>, vector<128x128xbf16>
    %cst_10 = arith.constant dense<0.000000e+00> : vector<2x128xf32>
    %17 = tpu.matmul %15, %16, %cst_10 {dimension_numbers = #tpu.dot_dimension_numbers<[1], [0], [0], [1], [0, 0, 1, 1], [], []>} : vector<2x128xbf16>, vector<128x128xbf16>, vector<2x128xf32> -> vector<2x128xf32>
    %c0_11 = arith.constant 0 : index
    %c0_12 = arith.constant 0 : index
    %18 = vector.load %arg4[%c0_11, %c0_12] : memref<1x128xf32, #tpu.memory_space<vmem>>, vector<1x128xf32>
    %19 = vector.broadcast %18 : vector<1x128xf32> to vector<2x128xf32>
    %20 = arith.addf %17, %19 : vector<2x128xf32>
    %c0_13 = arith.constant 0 : index
    %c0_14 = arith.constant 0 : index
    %21 = vector.load %arg5[%c0_13, %c0_14] : memref<2x128xf32, #tpu.memory_space<vmem>>, vector<2x128xf32>
    tpu.vector_store %arg5[%c0_13, %c0_14], %20 {strides = array<i32>} : memref<2x128xf32, #tpu.memory_space<vmem>>, vector<2x128xf32>,
    return
  }
}

module attributes {stable_mosaic.version = 11 : i64} {
  func.func @_sent_convs_kernel(%arg0: i32, %arg1: memref<8x12x32xbf16, #tpu.memory_space<vmem>>, %arg2: memref<96x128xbf16, #tpu.memory_space<vmem>>, %arg3: memref<128x128xbf16, #tpu.memory_space<vmem>>, %arg4: memref<160x128xbf16, #tpu.memory_space<vmem>>, %arg5: memref<3x128xf32, #tpu.memory_space<vmem>>, %arg6: memref<8x128xf32, #tpu.memory_space<vmem>>, %arg7: memref<8x128xf32, #tpu.memory_space<vmem>>) attributes {dimension_semantics = [#tpu.dimension_semantics<parallel>], iteration_bounds = array<i64: 2>, scalar_prefetch = 0 : i64, scratch_operands = 0 : i64, tpu.core_type = #tpu.core_type<tc>, window_params = [{transform_indices = @transform_0, window_bounds = array<i64: 8, 12, 32>}, {pipeline_mode = #tpu.pipeline_mode<synchronous>, transform_indices = @transform_1, window_bounds = array<i64: 96, 128>}, {pipeline_mode = #tpu.pipeline_mode<synchronous>, transform_indices = @transform_2, window_bounds = array<i64: 128, 128>}, {pipeline_mode = #tpu.pipeline_mode<synchronous>, transform_indices = @transform_3, window_bounds = array<i64: 160, 128>}, {pipeline_mode = #tpu.pipeline_mode<synchronous>, transform_indices = @transform_4, window_bounds = array<i64: 3, 128>}, {transform_indices = @transform_5, window_bounds = array<i64: 8, 128>}, {transform_indices = @transform_6, window_bounds = array<i64: 8, 128>}]} {
    %c0 = arith.constant 0 : index
    %c0_0 = arith.constant 0 : index
    %c0_1 = arith.constant 0 : index
    %0 = vector.load %arg1[%c0, %c0_0, %c0_1] : memref<8x12x32xbf16, #tpu.memory_space<vmem>>, vector<8x12x32xbf16>
    %1 = arith.extf %0 : vector<8x12x32xbf16> to vector<8x12x32xf32>
    %c0_2 = arith.constant 0 : index
    %c0_3 = arith.constant 0 : index
    %2 = vector.load %arg5[%c0_2, %c0_3] : memref<3x128xf32, #tpu.memory_space<vmem>>, vector<3x128xf32>
    %c0_4 = arith.constant 0 : index
    %c0_5 = arith.constant 0 : index
    %3 = vector.load %arg6[%c0_4, %c0_5] : memref<8x128xf32, #tpu.memory_space<vmem>>, vector<8x128xf32>
    %4 = vector.extract_strided_slice %1 {offsets = [0, 0, 0], sizes = [8, 10, 32], strides = [1, 1, 1]} : vector<8x12x32xf32> to vector<8x10x32xf32>
    %5 = vector.extract_strided_slice %1 {offsets = [0, 1, 0], sizes = [8, 10, 32], strides = [1, 1, 1]} : vector<8x12x32xf32> to vector<8x10x32xf32>
    %6 = vector.extract_strided_slice %1 {offsets = [0, 2, 0], sizes = [8, 10, 32], strides = [1, 1, 1]} : vector<8x12x32xf32> to vector<8x10x32xf32>
    %7 = tpu.concatenate %4, %5, %6 in 2 : vector<8x10x32xf32>, vector<8x10x32xf32>, vector<8x10x32xf32> -> vector<8x10x96xf32>
    %8 = arith.truncf %7 : vector<8x10x96xf32> to vector<8x10x96xbf16>
    %c0_6 = arith.constant 0 : index
    %c0_7 = arith.constant 0 : index
    %9 = vector.load %arg2[%c0_6, %c0_7] : memref<96x128xbf16, #tpu.memory_space<vmem>>, vector<96x128xbf16>
    %cst = arith.constant dense<0.000000e+00> : vector<8x10x128xf32>
    %10 = tpu.matmul %8, %9, %cst {dimension_numbers = #tpu.dot_dimension_numbers<[2], [0], [0, 1], [1], [0, 0, 0, 1, 1, 1], [], []>} : vector<8x10x96xbf16>, vector<96x128xbf16>, vector<8x10x128xf32> -> vector<8x10x128xf32>
    %11 = vector.extract_strided_slice %2 {offsets = [0, 0], sizes = [1, 128], strides = [1, 1]} : vector<3x128xf32> to vector<1x128xf32>
    %12 = vector.shape_cast %11 : vector<1x128xf32> to vector<1x1x128xf32>
    %13 = vector.broadcast %12 : vector<1x1x128xf32> to vector<8x10x128xf32>
    %14 = arith.addf %10, %13 : vector<8x10x128xf32>
    %cst_8 = arith.constant 0.000000e+00 : f32
    %15 = vector.broadcast %cst_8 : f32 to vector<8x10x128xf32>
    %16 = arith.maximumf %14, %15 : vector<8x10x128xf32>
    %cst_9 = arith.constant dense<0xFF800000> : vector<8x128xf32>
    %17 = vector.multi_reduction <maximumf>, %16, %cst_9 [1] : vector<8x10x128xf32> to vector<8x128xf32>
    %18 = arith.addf %3, %17 : vector<8x128xf32>
    %19 = vector.extract_strided_slice %1 {offsets = [0, 0, 0], sizes = [8, 9, 32], strides = [1, 1, 1]} : vector<8x12x32xf32> to vector<8x9x32xf32>
    %20 = vector.extract_strided_slice %1 {offsets = [0, 1, 0], sizes = [8, 9, 32], strides = [1, 1, 1]} : vector<8x12x32xf32> to vector<8x9x32xf32>
    %21 = vector.extract_strided_slice %1 {offsets = [0, 2, 0], sizes = [8, 9, 32], strides = [1, 1, 1]} : vector<8x12x32xf32> to vector<8x9x32xf32>
    %22 = vector.extract_strided_slice %1 {offsets = [0, 3, 0], sizes = [8, 9, 32], strides = [1, 1, 1]} : vector<8x12x32xf32> to vector<8x9x32xf32>
    %23 = tpu.concatenate %19, %20, %21, %22 in 2 : vector<8x9x32xf32>, vector<8x9x32xf32>, vector<8x9x32xf32>, vector<8x9x32xf32> -> vector<8x9x128xf32>
    %24 = arith.truncf %23 : vector<8x9x128xf32> to vector<8x9x128xbf16>
    %c0_10 = arith.constant 0 : index
    %c0_11 = arith.constant 0 : index
    %25 = vector.load %arg3[%c0_10, %c0_11] : memref<128x128xbf16, #tpu.memory_space<vmem>>, vector<128x128xbf16>
    %cst_12 = arith.constant dense<0.000000e+00> : vector<8x9x128xf32>
    %26 = tpu.matmul %24, %25, %cst_12 {dimension_numbers = #tpu.dot_dimension_numbers<[2], [0], [0, 1], [1], [0, 0, 0, 1, 1, 1], [], []>} : vector<8x9x128xbf16>, vector<128x128xbf16>, vector<8x9x128xf32> -> vector<8x9x128xf32>
    %27 = vector.extract_strided_slice %2 {offsets = [1, 0], sizes = [1, 128], strides = [1, 1]} : vector<3x128xf32> to vector<1x128xf32>
    %28 = vector.shape_cast %27 : vector<1x128xf32> to vector<1x1x128xf32>
    %29 = vector.broadcast %28 : vector<1x1x128xf32> to vector<8x9x128xf32>
    %30 = arith.addf %26, %29 : vector<8x9x128xf32>
    %cst_13 = arith.constant 0.000000e+00 : f32
    %31 = vector.broadcast %cst_13 : f32 to vector<8x9x128xf32>
    %32 = arith.maximumf %30, %31 : vector<8x9x128xf32>
    %cst_14 = arith.constant dense<0xFF800000> : vector<8x128xf32>
    %33 = vector.multi_reduction <maximumf>, %32, %cst_14 [1] : vector<8x9x128xf32> to vector<8x128xf32>
    %34 = arith.addf %18, %33 : vector<8x128xf32>
    %35 = vector.extract_strided_slice %1 {offsets = [0, 0, 0], sizes = [8, 8, 32], strides = [1, 1, 1]} : vector<8x12x32xf32> to vector<8x8x32xf32>
    %36 = vector.extract_strided_slice %1 {offsets = [0, 1, 0], sizes = [8, 8, 32], strides = [1, 1, 1]} : vector<8x12x32xf32> to vector<8x8x32xf32>
    %37 = vector.extract_strided_slice %1 {offsets = [0, 2, 0], sizes = [8, 8, 32], strides = [1, 1, 1]} : vector<8x12x32xf32> to vector<8x8x32xf32>
    %38 = vector.extract_strided_slice %1 {offsets = [0, 3, 0], sizes = [8, 8, 32], strides = [1, 1, 1]} : vector<8x12x32xf32> to vector<8x8x32xf32>
    %39 = vector.extract_strided_slice %1 {offsets = [0, 4, 0], sizes = [8, 8, 32], strides = [1, 1, 1]} : vector<8x12x32xf32> to vector<8x8x32xf32>
    %40 = tpu.concatenate %35, %36, %37, %38, %39 in 2 : vector<8x8x32xf32>, vector<8x8x32xf32>, vector<8x8x32xf32>, vector<8x8x32xf32>, vector<8x8x32xf32> -> vector<8x8x160xf32>
    %41 = arith.truncf %40 : vector<8x8x160xf32> to vector<8x8x160xbf16>
    %c0_15 = arith.constant 0 : index
    %c0_16 = arith.constant 0 : index
    %42 = vector.load %arg4[%c0_15, %c0_16] : memref<160x128xbf16, #tpu.memory_space<vmem>>, vector<160x128xbf16>
    %cst_17 = arith.constant dense<0.000000e+00> : vector<8x8x128xf32>
    %43 = tpu.matmul %41, %42, %cst_17 {dimension_numbers = #tpu.dot_dimension_numbers<[2], [0], [0, 1], [1], [0, 0, 0, 1, 1, 1], [], []>} : vector<8x8x160xbf16>, vector<160x128xbf16>, vector<8x8x128xf32> -> vector<8x8x128xf32>
    %44 = vector.extract_strided_slice %2 {offsets = [2, 0], sizes = [1, 128], strides = [1, 1]} : vector<3x128xf32> to vector<1x128xf32>
    %45 = vector.shape_cast %44 : vector<1x128xf32> to vector<1x1x128xf32>
    %46 = vector.broadcast %45 : vector<1x1x128xf32> to vector<8x8x128xf32>
    %47 = arith.addf %43, %46 : vector<8x8x128xf32>
    %cst_18 = arith.constant 0.000000e+00 : f32
    %48 = vector.broadcast %cst_18 : f32 to vector<8x8x128xf32>
    %49 = arith.maximumf %47, %48 : vector<8x8x128xf32>
    %cst_19 = arith.constant dense<0xFF800000> : vector<8x128xf32>
    %50 = vector.multi_reduction <maximumf>, %49, %cst_19 [1] : vector<8x8x128xf32> to vector<8x128xf32>
    %51 = arith.addf %34, %50 : vector<8x128xf32>
    %c0_20 = arith.constant 0 : index
    %c0_21 = arith.constant 0 : index
    %52 = vector.load %arg7[%c0_20, %c0_21] : memref<8x128xf32, #tpu.memory_space<vmem>>, vector<8x128xf32>
    tpu.vector_store %arg7[%c0_20, %c0_21], %51 {strides = array<i32>} : memref<8x128xf32, #tpu.memory_space<vmem>>, vector<8x128xf32>,
    return
  }
  func.func @transform_0(%arg0: i32) -> (i32, i32, i32) {
    %c0_i32 = arith.constant 0 : i32
    %c0_i32_0 = arith.constant 0 : i32
    %c0_i32_1 = arith.constant 0 : i32
    return %arg0, %c0_i32, %c0_i32_0 : i32, i32, i32
  }
  func.func @transform_1(%arg0: i32) -> (i32, i32) {
    %c0_i32 = arith.constant 0 : i32
    %c0_i32_0 = arith.constant 0 : i32
    %c0_i32_1 = arith.constant 0 : i32
    return %c0_i32, %c0_i32_0 : i32, i32
  }
  func.func @transform_2(%arg0: i32) -> (i32, i32) {
    %c0_i32 = arith.constant 0 : i32
    %c0_i32_0 = arith.constant 0 : i32
    %c0_i32_1 = arith.constant 0 : i32
    return %c0_i32, %c0_i32_0 : i32, i32
  }
  func.func @transform_3(%arg0: i32) -> (i32, i32) {
    %c0_i32 = arith.constant 0 : i32
    %c0_i32_0 = arith.constant 0 : i32
    %c0_i32_1 = arith.constant 0 : i32
    return %c0_i32, %c0_i32_0 : i32, i32
  }
  func.func @transform_4(%arg0: i32) -> (i32, i32) {
    %c0_i32 = arith.constant 0 : i32
    %c0_i32_0 = arith.constant 0 : i32
    %c0_i32_1 = arith.constant 0 : i32
    return %c0_i32, %c0_i32_0 : i32, i32
  }
  func.func @transform_5(%arg0: i32) -> (i32, i32) {
    %c0_i32 = arith.constant 0 : i32
    %c0_i32_0 = arith.constant 0 : i32
    return %arg0, %c0_i32 : i32, i32
  }
  func.func @transform_6(%arg0: i32) -> (i32, i32) {
    %c0_i32 = arith.constant 0 : i32
    %c0_i32_0 = arith.constant 0 : i32
    return %arg0, %c0_i32 : i32, i32
  }
}

</mosaic_0001>

<bundles_post_ra>
// kernel: cnn_han_forward.3
= control target key start
LH: loop header
LB: loop body
LE: loop exit
PB: predicated region body
PF: predicated region fallthrough
CT: control target
= control target key end

     0   :  { %v712_v2 = vmov 0.0   ;;  %vm713_vm0 = vmmov 0   ;;  %v104_v18 = vlaneseq  ;;  %v714_v29 = vmov 1983009808   ;;  %s886_s0 = inlined_call_operand.vmem [shape: f32[2,6,128], index: 0, kind: input, shape index: {}]   ;;  %s887_s1 = inlined_call_operand.vmem [shape: bf16[384,128], index: 1, kind: input, shape index: {}]   ;;  %s888_s2 = inlined_call_operand.vmem [shape: f32[1,128], index: 2, kind: input, shape index: {}]   ;;  %s889_s3 = inlined_call_operand.vmem [shape: bf16[128,128], index: 3, kind: input, shape index: {}]   ;;  %s890_s4 = inlined_call_operand.vmem [shape: f32[1,128], index: 4, kind: input, shape index: {}]   ;;  %s891_s5 = inlined_call_operand.hbm [shape: f32[2,128], index: 5, kind: output, shape index: {}]  }
   0x1   :  { %v656_v0 = vld [vmem:[%s887_s1 + $0x40] sm:$0xff]   ;;  %612 = vmatprep.subr.bf16.mxu1 %v712_v2  ;;  %628 = vmatprep.mubr.msk.bf16.mxu1 %vm713_vm0, %v712_v2  ;;  %v659_v4 = vld [vmem:[%s887_s1 + $0x48] sm:$0xff]   ;;  %v662_v7 = vld [vmem:[%s887_s1 + $0x50] sm:$0xff]   ;;  %v102_v30 = vunpack.c.l.s4 %v714_v29 }
   0x2   :  { %v657_v1 = vld [vmem:[%s887_s1] sm:$0xff]   ;;  %572 = vmatprep.subr.bf16.mxu0 %v656_v0  ;;  %v660_v5 = vld [vmem:[%s887_s1 + $0x8] sm:$0xff]   ;;  %v663_v8 = vld [vmem:[%s887_s1 + $0x10] sm:$0xff]   ;;  %v105_v24 = vshrl.u32 %v104_v18, 7 }
   0x3   :  { %v658_v3 = vld [vmem:[%s887_s1 + $0x80] sm:$0xff]   ;;  %573 = vmatpush3.bf16.msra.mxu0 %v657_v1  ;;  %v661_v6 = vld [vmem:[%s887_s1 + $0x88] sm:$0xff]   ;;  %v664_v9 = vld [vmem:[%s887_s1 + $0x90] sm:$0xff]   ;;  %v103_v35 = vunpack.c.0.s8 %v102_v30 }
   0x4   :  { %613 = vmatpush3.bf16.msra.mxu1 %v658_v3  ;;  %574 = vmatprep.subr.bf16.mxu0 %v659_v4  ;;  %v665_v10 = vld [vmem:[%s887_s1 + $0x58] sm:$0xff]   ;;  %v668_v13 = vld [vmem:[%s887_s1 + $0x60] sm:$0xff]   ;;  %v671_v16 = vld [vmem:[%s887_s1 + $0x68] sm:$0xff]  }
   0x5   :  { %614 = vmatprep.subr.bf16.mxu1 %v712_v2  ;;  %v666_v11 = vld [vmem:[%s887_s1 + $0x18] sm:$0xff]   ;;  %v669_v14 = vld [vmem:[%s887_s1 + $0x20] sm:$0xff]   ;;  %v672_v17 = vld [vmem:[%s887_s1 + $0x28] sm:$0xff]   ;;  %v106_v40 = vsub.s32 %v103_v35, %v105_v24 }
   0x6   :  { %v667_v12 = vld [vmem:[%s887_s1 + $0x98] sm:$0xff]   ;;  %v670_v15 = vld [vmem:[%s887_s1 + $0xa0] sm:$0xff]   ;;  %v673_v19 = vld [vmem:[%s887_s1 + $0xa8] sm:$0xff]  }
   0x7   :  { %575 = vmatpush3.bf16.msra.mxu0 %v660_v5  ;;  %v674_v20 = vld [vmem:[%s887_s1 + $0x70] sm:$0xff]   ;;  %v677_v23 = vld [vmem:[%s887_s1 + $0x78] sm:$0xff]   ;;  %v22_v25 = vld [vmem:[%s886_s0] sm:$0x3f] }
   0x8   :  { %615 = vmatpush3.bf16.msra.mxu1 %v661_v6  ;;  %576 = vmatprep.subr.bf16.mxu0 %v662_v7  ;;  %v675_v21 = vld [vmem:[%s887_s1 + $0x30] sm:$0xff]   ;;  %v23_v26 = vld [vmem:[%s886_s0 + $0x8] sm:$0x3f]  ;;  %v26_v27 = vrot.slane %v22_v25, 1  ;;  %v678_v31 = vld [vmem:[%s887_s1 + $0x38] sm:$0xff]   ;;  %v30_v32 = vrot.slane %v22_v25, 2 }
   0x9   :  { %616 = vmatprep.subr.bf16.mxu1 %v712_v2  ;;  %v676_v22 = vld [vmem:[%s887_s1 + $0xb0] sm:$0xff]   ;;  %v27_v28 = vrot.slane %v23_v26, 1  ;;  %v31_v33 = vrot.slane %v23_v26, 2  ;;  %v679_v37 = vld [vmem:[%s887_s1 + $0xb8] sm:$0xff]  }
   0xa   :  { %v535_v34 = vpack.c.bf16 %v26_v27, %v22_v25  ;;  %v36_v38 = vpack.c.bf16 %v30_v32, %v30_v32 }
   0xb   :  { %577 = vmatpush3.bf16.msra.mxu0 %v663_v8  ;;  %v536_v36 = vpack.c.bf16 %v27_v28, %v23_v26  ;;  %v39_v39 = vpack.c.bf16 %v31_v33, %v31_v33 }
   0xc   :  { %617 = vmatpush3.bf16.msra.mxu1 %v664_v9  ;;  %578 = vmatprep.subr.bf16.mxu0 %v665_v10  ;;  %v107_v41 = vrot.slane %v535_v34, %v106_v40  ;;  %v114_v43 = vrot.slane %v36_v38, %v106_v40 }
   0xd   :  { %618 = vmatprep.subr.bf16.mxu1 %v712_v2  ;;  %v123_v42 = vrot.slane %v536_v36, %v106_v40  ;;  %v130_v44 = vrot.slane %v39_v39, %v106_v40 }
   0xf   :  { %579 = vmatpush3.bf16.msra.mxu0 %v666_v11 }
  0x10   :  { %619 = vmatpush3.bf16.msra.mxu1 %v667_v12  ;;  %580 = vmatprep.subr.bf16.mxu0 %v668_v13 }
  0x11   :  { %620 = vmatprep.subr.bf16.mxu1 %v712_v2 }
  0x13   :  { %581 = vmatpush3.bf16.msra.mxu0 %v669_v14 }
  0x14   :  { %621 = vmatpush3.bf16.msra.mxu1 %v670_v15  ;;  %582 = vmatprep.subr.bf16.mxu0 %v671_v16 }
  0x15   :  { %622 = vmatprep.subr.bf16.mxu1 %v712_v2 }
  0x17   :  { %583 = vmatpush3.bf16.msra.mxu0 %v672_v17 }
  0x18   :  { %623 = vmatpush3.bf16.msra.mxu1 %v673_v19  ;;  %584 = vmatprep.subr.bf16.mxu0 %v674_v20 }
  0x19   :  { %624 = vmatprep.subr.bf16.mxu1 %v712_v2 }
  0x1b   :  { %585 = vmatpush3.bf16.msra.mxu0 %v675_v21 }
  0x1c   :  { %625 = vmatpush3.bf16.msra.mxu1 %v676_v22  ;;  %586 = vmatprep.subr.bf16.mxu0 %v677_v23 }
  0x1d   :  { %626 = vmatprep.subr.bf16.mxu1 %v712_v2 }
  0x1f   :  { %587 = vmatpush3.bf16.msra.mxu0 %v678_v31 }
  0x20   :  { %10 = vsyncpa [#allocation3], 0  ;;  %v537_v45 = vcombine.low %v107_v41, %v123_v42  ;;  %627 = vmatpush3.bf16.msra.mxu1 %v679_v37  ;;  %v538_v46 = vcombine.low %v114_v43, %v130_v44  ;;  %632 = vmatprep.subr.bf16.mxu0 %v712_v2  ;;  %v680_v50 = vld [vmem:[%s889_s3] sm:$0xff]   ;;  %v681_v51 = vld [vmem:[%s889_s3 + $0x8] sm:$0xff]   ;;  %vm383_vm1 = vcmask 1043456   ;;  %vm427_vm2 = vcmask 1041409  }
  0x21   :  { %v682_v52 = vld [vmem:[%s889_s3 + $0x10] sm:$0xff]   ;;  %v683_v53 = vld [vmem:[%s889_s3 + $0x18] sm:$0xff]   ;;  %v684_v54 = vld [vmem:[%s889_s3 + $0x20] sm:$0xff]   ;;  %s715_s11 = smov [#allocation2]  }
  0x22   :  { %v140_v47 = vrot.slane %v537_v45, %v106_v40  ;;  %v147_v48 = vrot.slane %v538_v46, %v106_v40  ;;  %v685_v55 = vld [vmem:[%s889_s3 + $0x28] sm:$0xff]   ;;  %v686_v56 = vld [vmem:[%s889_s3 + $0x30] sm:$0xff]   ;;  %v687_v57 = vld [vmem:[%s889_s3 + $0x38] sm:$0xff]   ;;  %s526_s12 = sshll.u32 %s715_s11, 4  ;;  %s527_s12 = int_to_ptr.vmem [resolvable:$true] %s526_s12 }
  0x23   :  { %v534_v58 = vld [vmem:[%s888_s2] ss:$0 sm:$0xff]  ;;  %s688_s13 = scalar_lea.vmem %s527_s12, 32  ;;  %p693_p1 = scmp.lt.s32.totalorder %s527_s12, %s527_s12 }
  0x24   :  { %v148_v49 = vcombine.high %v140_v47, %v140_v47  ;;  %629 = vmatmul.mubr.bf16.vlgmr.msra.gmra.mrb[0].mxu1 %v147_v48  ;;  %v296_v63 = vcombine.low %v534_v58, %v534_v58  ;;  %v563_v30 = vld [vmem:[%s890_s4] ss:$0 sm:$0xff]  ;;  %p689_p0 = scmp.ne.s32.totalorder %s527_s12, %s688_s13  ;;  %p694_p2 = scmp.lt.s32.totalorder %s688_s13, %s688_s13 }
  0x26   :  { %330 = vmatprep.mubr.bf16.mxu0 %v148_v49  ;;  %p695_p3 = por %p694_p2, %p693_p1 }
  0x27   :  { %331 = vmatmul.mubr.bf16.vlgmr.msra.gmra.mrb[0].mxu0 %v140_v47 }
  0x28   :  { %648 = vmatprep.mubr.msk.bf16.mxu0 %vm713_vm0, %v712_v2  ;;  %633 = vmatpush3.bf16.msra.mxu0 %v680_v50  ;;  %p696_p4 = pnand %p695_p3, %p689_p0 }
  0x29   :  { %634 = vmatprep.subr.bf16.mxu0 %v712_v2 }
  0x2c   :  { %635 = vmatpush3.bf16.msra.mxu0 %v681_v51 }
  0x2d   :  { %636 = vmatprep.subr.bf16.mxu0 %v712_v2 }
  0x30   :  { %637 = vmatpush3.bf16.msra.mxu0 %v682_v52 }
  0x31   :  { %638 = vmatprep.subr.bf16.mxu0 %v712_v2 }
  0x34   :  { %639 = vmatpush3.bf16.msra.mxu0 %v683_v53 }
  0x35   :  { %640 = vmatprep.subr.bf16.mxu0 %v712_v2 }
  0x38   :  { %641 = vmatpush3.bf16.msra.mxu0 %v684_v54 }
  0x39   :  { %642 = vmatprep.subr.bf16.mxu0 %v712_v2 }
  0x3c   :  { %643 = vmatpush3.bf16.msra.mxu0 %v685_v55 }
  0x3d   :  { %644 = vmatprep.subr.bf16.mxu0 %v712_v2 }
  0x40   :  { %645 = vmatpush3.bf16.msra.mxu0 %v686_v56 }
  0x41   :  { %646 = vmatprep.subr.bf16.mxu0 %v712_v2 }
  0x44   :  { %647 = vmatpush3.bf16.msra.mxu0 %v687_v57 }
  0xf7   :  { %v372_v59 = vpop.f32.mrb[0].mxu1 }
  0xf8   :  { %v630_v60 = vpop.f32.mrb[1].mxu1 }
  0xf9   :  { %v375_v61 = vpop.f32.mrb[2].mxu1 }
  0xfa   :  { %v588_v62 = vpop.f32.mrb[0].mxu0  ;;  %v631_v0 = vpop.f32.mrb[3].mxu1 }
  0xfb   :  { %v589_v1 = vpop.f32.mrb[1].mxu0 }
  0xfc   :  { %v590_v3 = vadd.f32 %v589_v1, %v588_v62  ;;  %v591_v4 = vpop.f32.mrb[2].mxu0 }
  0xfd   :  { %v592_v5 = vpop.f32.mrb[3].mxu0 }
  0xfe   :  { %v333_v2 = vadd.f32 %v590_v3, %v296_v63 }
 0x100   :  { %v373_v6 = vadd.f32 %v372_v59, %v333_v2 }
 0x102   :  { %v379_v7 = vcombine.high %v373_v6, %v373_v6  ;;  %v381_v8 = vmax.f32 %v373_v6, 0.0 }
 0x104   :  { %v382_v9 = vmax.f32 %v379_v7, 0.0  ;;  %v384_v10 = vsel %vm383_vm1, %v381_v8, -inf }
 0x105   :  { %v385_v11 = vrot.slane %v384_v10, 4 }
 0x106   :  { %v391_v12 = vsel %vm383_vm1, %v382_v9, -inf }
 0x107   :  { %v386_v13 = vmax.f32 %v384_v10, %v385_v11  ;;  %v392_v14 = vrot.slane %v391_v12, 4 }
 0x109   :  { %v387_v15 = vrot.slane %v386_v13, 2  ;;  %v393_v16 = vmax.f32 %v391_v12, %v392_v14 }
 0x10b   :  { %v388_v17 = vmax.f32 %v386_v13, %v387_v15  ;;  %v394_v18 = vrot.slane %v393_v16, 2 }
 0x10d   :  { %v389_v19 = vrot.slane %v388_v17, 1  ;;  %v395_v20 = vmax.f32 %v393_v16, %v394_v18 }
 0x10f   :  { %v390_v21 = vmax.f32 %v388_v17, %v389_v19  ;;  %v396_v22 = vrot.slane %v395_v20, 1 }
 0x111   :  { %v397_v23 = vmax.f32 %v395_v20, %v396_v22  ;;  %v398_v24 = vpack.c.bf16 %v390_v21, %v390_v21 }
 0x113   :  { %v399_v25 = vpack.c.bf16 %v397_v23, %v397_v23  ;;  %v425_v26 = vunpack.c.l.b16 %v398_v24 }
 0x115   :  { %v426_v27 = vunpack.c.l.b16 %v399_v25 }
 0x117   :  { %v428_v28 = vsel %vm427_vm2, %v426_v27, %v425_v26 }
 0x118   :  { %v429_v29 = vpack.c.b16 %v428_v28, %v428_v28 }
 0x11a   :  { %649 = vmatmul.mubr.bf16.vlgmr.msra.gmra.mrb[4].mxu0 %v429_v29 }
 0x1ed   :  { %v513_v31 = vpop.f32.mrb[4].mxu0 }
 0x1ee   :  { %v514_v32 = vadd.f32 %v563_v30, %v513_v31  ;;  %v650_v33 = vpop.f32.mrb[5].mxu0 }
 0x1ef   :  { %v516_v34 = vpop.f32.mrb[6].mxu0 }
 0x1f0   :  { %519 = vst [vmem:[#allocation2] sm:$0x3] %v514_v32  ;;  %v651_v35 = vpop.f32.mrb[7].mxu0 }
 0x1f1   :  { %699 = shalt.err (!%p696_p4)
}
 0x1f2   :  { %s700_s4 = scalar_lea.hbm %s891_s5, 32 }
 0x1f3   :  { %p701_p5 = scmp.ne.s32.totalorder %s891_s5, %s700_s4  ;;  %p704_p6 = scmp.lt.u32.totalorder %s700_s4, %s891_s5 }
 0x1f5   :  { %p706_p7 = pnand %p704_p6, %p701_p5 }
 0x1f7   :  { %709 = shalt.err (!%p706_p7)
}
 0x1f8   :  { %529 = dma.vmem_to_hbm [thread:$0]  %s527_s12, 32, %s891_s5, [#allocation3]  }
 0x1f9   :  { %710 = dma.done.wait [#allocation3], 32  }
 0x1fa   :  { %711 = vsyncadd [#allocation3], 4294967264 }
 0x1fb   :  { %533 = vsyncpa [#allocation3], 1 }

// kernel: cnn_han_forward.2
= control target key start
LH: loop header
LB: loop body
LE: loop exit
PB: predicated region body
PF: predicated region fallthrough
CT: control target
= control target key end

     0   :  { %s5074_s21 = smov 0   ;;  %s6516_s0 = inlined_call_operand.vmem [shape: bf16[16,12,32], index: 0, kind: input, shape index: {}]   ;;  %s6517_s1 = inlined_call_operand.vmem [shape: bf16[96,128], index: 1, kind: input, shape index: {}]   ;;  %s6518_s2 = inlined_call_operand.vmem [shape: bf16[128,128], index: 2, kind: input, shape index: {}]   ;;  %s6519_s3 = inlined_call_operand.vmem [shape: bf16[160,128], index: 3, kind: input, shape index: {}]   ;;  %s6520_s4 = inlined_call_operand.vmem [shape: f32[3,128], index: 4, kind: input, shape index: {}]   ;;  %s6521_s5 = inlined_call_operand.vmem [shape: f32[16,128], index: 5, kind: input, shape index: {}]   ;;  %s6522_s6 = inlined_call_operand.vmem [shape: f32[16,128], index: 6, kind: output, shape index: {}]  }
   0x1 LB: > { %s5080_s22 = sadd.s32 4294967295, %s5029_s21   ;;  %p4649_p0 = scmp.ge.s32.totalorder %s5029_s21, 1  ;;  %s5029_s21 = sphi %s5074_s21, %s16_s21  }
   0x2   : > { %p223_p1 = scmp.lt.s32.totalorder %s5029_s21, 3 }
   0x4   : > { %p224_p2 = pnand %p4649_p0, %p223_p1 }
   0x6   : > { %227 = sbr.rel (%p224_p2) target bundleno = 599 (0x257), region = 44 }
   0xd   : > { %s4650_s23 = sshll.u32 %s5080_s22, 3  ;;  %v4999_v0 = vld [vmem:[%s6518_s2] sm:$0xff]   ;;  %v6525_v1 = vmov 0.0   ;;  %vm396_vm0 = vcmask 1045504   ;;  %vm323_vm1 = vcmask 1046528   ;;  %vm1882_vm2 = vcmask 1044480  }
   0xe   : > { %p258_p3 = scmp.lt.s32.totalorder %s4650_s23, 15  ;;  %4807 = vmatprep.subr.bf16.mxu1 %v6525_v1  ;;  %4775 = vmatprep.subr.bf16.mxu0 %v6525_v1  ;;  %v5000_v2 = vld [vmem:[%s6517_s1] sm:$0xff]   ;;  %v5001_v3 = vld [vmem:[%s6518_s2 + $0x8] sm:$0xff]   ;;  %v5003_v35 = vld [vmem:[%s6518_s2 + $0x10] sm:$0xff]   ;;  %s5032_s16 = smov 64   ;;  %vm5035_vm3 = vmmov 0  }
   0xf   : > { %4808 = vmatpush3.bf16.msra.mxu1 %v4999_v0  ;;  %4776 = vmatpush3.bf16.msra.mxu0 %v5000_v2  ;;  %v5002_v30 = vld [vmem:[%s6517_s1 + $0x8] sm:$0xff]   ;;  %v5004_v39 = vld [vmem:[%s6517_s1 + $0x10] sm:$0xff]   ;;  %s5033_s17 = smov 32   ;;  %v5005_v55 = vld [vmem:[%s6518_s2 + $0x18] sm:$0xff]   ;;  %s5034_s24 = smov 96   ;;  %vm469_vm4 = vcmask 261120  }
  0x10   : > { %s6608_s23 = smov (!%p258_p3, %s4650_s23), 15  ;;  %4809 = vmatprep.subr.bf16.mxu1 %v6525_v1  ;;  %4777 = vmatprep.subr.bf16.mxu0 %v6525_v1  ;;  %v5006_v58 = vld [vmem:[%s6517_s1 + $0x18] sm:$0xff]   ;;  %vm486_vm5 = vcmask 523264   ;;  %vm4252_vm6 = vcmask 1043456   ;;  %vm1196_vm7 = vcmask 785408   ;;  %vm1793_vm8 = vcmask 1041408  }
  0x11   : > { %s4742_s28 = sshll.u32 %s6608_s23, 3  ;;  %4787 = vmatprep.mubr.msk.bf16.mxu0 %vm5035_vm3, %v6525_v1  ;;  %4823 = vmatprep.mubr.msk.bf16.mxu1 %vm5035_vm3, %v6525_v1  ;;  %vm4170_vm9 = vcmask 1040384   ;;  %vm1866_vm10 = vcmask 1041409   ;;  %vm1868_vm11 = vcmask 1042434   ;;  %vm1870_vm12 = vcmask 1043459   ;;  %p264_p4 = scmp.lt.s32.totalorder %s5080_s22, 1 }
  0x12   : > { %s5097_s7 = scalar_lea.vmem %s6516_s0, %s4742_s28  ;;  %vm1872_vm13 = vcmask 1044484   ;;  %vm1874_vm14 = vcmask 1045509   ;;  %vm1876_vm15 = vcmask 1046534  }
  0x13   : > { %v273_v4 = vld [vmem:[%s5097_s7] ss:$8 sps:$4 sm:$0xff]   ;;  %v274_v5 = vld [vmem:[%s5097_s7 + $0x4] sm:$0x3]  ;;  %v276_v6 = vld [vmem:[%s5097_s7 + $0xc] sm:$0x3]  ;;  %4810 = vmatpush3.bf16.msra.mxu1 %v5001_v3  ;;  %4778 = vmatpush3.bf16.msra.mxu0 %v5002_v30 }
  0x14   : > { %v5106_v7 = vunpack.c.l.bf16 %v273_v4  ;;  %v5108_v8 = vunpack.c.l.bf16 %v274_v5  ;;  %v5110_v9 = vunpack.c.h.bf16 %v273_v4  ;;  %v5112_v10 = vunpack.c.l.bf16 %v276_v6  ;;  %v279_v11 = vld [vmem:[%s5097_s7 + $0x10] ss:$8 sps:$4 sm:$0xff]   ;;  %v280_v12 = vld [vmem:[%s5097_s7 + $0x1c] sm:$0x3]  ;;  %v278_v13 = vld [vmem:[%s5097_s7 + $0x14] sm:$0x3]  ;;  %4811 = vmatprep.subr.bf16.mxu1 %v6525_v1  ;;  %4779 = vmatprep.subr.bf16.mxu0 %v6525_v1 }
  0x15   : > { %v5117_v14 = vunpack.c.h.bf16 %v279_v11  ;;  %v5119_v15 = vunpack.c.l.bf16 %v280_v12  ;;  %v5121_v16 = vunpack.c.l.bf16 %v279_v11  ;;  %v5123_v17 = vunpack.c.l.bf16 %v278_v13  ;;  %v281_v50 = vld [vmem:[%s5097_s7 + $0x20] ss:$8 sps:$4 sm:$0xff]   ;;  %v282_v51 = vld [vmem:[%s5097_s7 + $0x24] sm:$0x3]  ;;  %v284_v59 = vld [vmem:[%s5097_s7 + $0x2c] sm:$0x3] }
  0x16   : > { %v397_v18 = vrot.slane %v5106_v7, 2  ;;  %v398_v19 = vrot.slane %v5108_v8, 2  ;;  %v324_v20 = vrot.slane %v5106_v7, 1  ;;  %v325_v21 = vrot.slane %v5108_v8, 1  ;;  %v5007_v11 = vld [vmem:[%s6518_s2 + $0x20] sm:$0xff]   ;;  %s6610_s22 = smov (!%p264_p4, %s5080_s22), 1 }
  0x17   : > { %6544 = vst [vmem:[#allocation2_spill] sm:$0xff] %v5117_v14  ;;  %6545 = vst [vmem:[#allocation3_spill] sm:$0xff] %v5119_v15  ;;  %v400_v22 = vrot.slane %v5110_v9, 2  ;;  %v401_v23 = vrot.slane %v5112_v10, 2  ;;  %v327_v24 = vrot.slane %v5110_v9, 1  ;;  %v328_v25 = vrot.slane %v5112_v10, 1  ;;  %4812 = vmatpush3.bf16.msra.mxu1 %v5003_v35  ;;  %4780 = vmatpush3.bf16.msra.mxu0 %v5004_v39 }
  0x18   : > { %6546 = vst [vmem:[#allocation4_spill] sm:$0xff] %v5121_v16  ;;  %6547 = vst [vmem:[#allocation5_spill] sm:$0xff] %v5123_v17  ;;  %v399_v26 = vsel %vm396_vm0, %v397_v18, %v398_v19  ;;  %v326_v27 = vsel %vm323_vm1, %v324_v20, %v325_v21  ;;  %v1883_v28 = vrot.slane %v5106_v7, 3  ;;  %v1884_v29 = vrot.slane %v5108_v8, 3  ;;  %4813 = vmatprep.subr.bf16.mxu1 %v6525_v1  ;;  %v5008_v12 = vld [vmem:[%s6517_s1 + $0x20] sm:$0xff]   ;;  %s4653_s13 = sshll.u32 %s6610_s22, 3 }
  0x19   : > { %v4889_v31 = vpack.i.bf16 %v398_v19, %v399_v26  ;;  %v4879_v32 = vpack.i.bf16 %v325_v21, %v326_v27  ;;  %v402_v33 = vsel %vm396_vm0, %v400_v22, %v401_v23  ;;  %v329_v34 = vsel %vm323_vm1, %v327_v24, %v328_v25  ;;  %4781 = vmatprep.subr.bf16.mxu0 %v6525_v1  ;;  %v285_v27 = vld [vmem:[%s5097_s7 + $0x30] ss:$8 sps:$4 sm:$0xff]   ;;  %s271_s19 = scalar_lea.vmem %s6522_s6, %s4653_s13 }
  0x1a   : > { %v4894_v36 = vpack.i.bf16 %v401_v23, %v402_v33  ;;  %v4884_v37 = vpack.i.bf16 %v328_v25, %v329_v34  ;;  %v1886_v38 = vrot.slane %v5110_v9, 3  ;;  %v1885_v40 = vsel %vm1882_vm2, %v1883_v28, %v1884_v29  ;;  %v286_v28 = vld [vmem:[%s5097_s7 + $0x34] sm:$0x3] }
  0x1b   : > { %4890 = vrot.lane.b32.xlu1 %v4889_v31, %s5032_s16  ;;  %4880 = vrot.lane.b32.xlu0 %v4879_v32, %s5033_s17  ;;  %v1887_v41 = vrot.slane %v5112_v10, 3  ;;  %v333_v42 = vrot.slane %v5117_v14, 1  ;;  %v334_v43 = vrot.slane %v5119_v15, 1  ;;  %v330_v44 = vrot.slane %v5121_v16, 1 }
  0x1c   : > { %v331_v45 = vrot.slane %v5123_v17, 1  ;;  %v406_v47 = vrot.slane %v5117_v14, 2  ;;  %v407_v48 = vrot.slane %v5119_v15, 2  ;;  %v4904_v49 = vpack.i.bf16 %v1884_v29, %v1885_v40  ;;  %4814 = vmatpush3.bf16.msra.mxu1 %v5005_v55  ;;  %4782 = vmatpush3.bf16.msra.mxu0 %v5006_v58 }
  0x1d   : > { %v1888_v46 = vsel %vm1882_vm2, %v1886_v38, %v1887_v41  ;;  %v335_v53 = vsel %vm323_vm1, %v333_v42, %v334_v43  ;;  %v403_v56 = vrot.slane %v5121_v16, 2  ;;  %v404_v57 = vrot.slane %v5123_v17, 2  ;;  %4815 = vmatprep.subr.bf16.mxu1 %v6525_v1  ;;  %4783 = vmatprep.subr.bf16.mxu0 %v6525_v1  ;;  %v5010_v38 = vld [vmem:[%s6517_s1 + $0x28] sm:$0xff]  }
  0x1e   : > { %v4899_v52 = vpack.i.bf16 %v1887_v41, %v1888_v46  ;;  %v332_v54 = vsel %vm323_vm1, %v330_v44, %v331_v45  ;;  %v4914_v60 = vpack.i.bf16 %v334_v43, %v335_v53  ;;  %v408_v62 = vsel %vm396_vm0, %v406_v47, %v407_v48 }
  0x1f   : > { %4895 = vrot.lane.b32.xlu1 %v4894_v36, %s5032_s16  ;;  %4885 = vrot.lane.b32.xlu0 %v4884_v37, %s5033_s17  ;;  %v4909_v61 = vpack.i.bf16 %v331_v45, %v332_v54  ;;  %v1889_v63 = vrot.slane %v5121_v16, 3  ;;  %v1890_v0 = vrot.slane %v5123_v17, 3  ;;  %v5185_v2 = vunpack.c.l.bf16 %v281_v50  ;;  %v5009_v37 = vld [vmem:[%s6518_s2 + $0x28] sm:$0xff]  }
  0x20   : > { %v5187_v3 = vunpack.c.l.bf16 %v282_v51  ;;  %v405_v4 = vsel %vm396_vm0, %v403_v56, %v404_v57  ;;  %v1892_v5 = vrot.slane %v5117_v14, 3  ;;  %v1893_v6 = vrot.slane %v5119_v15, 3  ;;  %4816 = vmatpush3.bf16.msra.mxu1 %v5007_v11  ;;  %4784 = vmatpush3.bf16.msra.mxu0 %v5008_v12 }
  0x21   : > { %6548 = vst [vmem:[#allocation6_spill] sm:$0xff] %v5185_v2  ;;  %v4924_v13 = vpack.i.bf16 %v407_v48, %v408_v62  ;;  %v5199_v18 = vunpack.c.h.bf16 %v281_v50  ;;  %v5201_v19 = vunpack.c.l.bf16 %v284_v59  ;;  %v4919_v20 = vpack.i.bf16 %v404_v57, %v405_v4  ;;  %4817 = vmatprep.subr.bf16.mxu1 %v6525_v1  ;;  %4785 = vmatprep.subr.bf16.mxu0 %v6525_v1 }
  0x22   : > { %6549 = vst [vmem:[#allocation7_spill] sm:$0xff] %v5187_v3  ;;  %v1891_v21 = vsel %vm1882_vm2, %v1889_v63, %v1890_v0  ;;  %v409_v22 = vrot.slane %v5185_v2, 2  ;;  %v410_v23 = vrot.slane %v5187_v3, 2  ;;  %v1894_v24 = vsel %vm1882_vm2, %v1892_v5, %v1893_v6 }
  0x23   : > { %4905 = vrot.lane.b32.xlu1 %v4904_v49, %s5034_s24  ;;  %4900 = vrot.lane.b32.xlu0 %v4899_v52, %s5034_s24  ;;  %6550 = vst [vmem:[#allocation8_spill] sm:$0xff] %v5199_v18  ;;  %6551 = vst [vmem:[#allocation9_spill] sm:$0xff] %v5201_v19  ;;  %v336_v25 = vrot.slane %v5185_v2, 1  ;;  %v337_v26 = vrot.slane %v5187_v3, 1  ;;  %v4934_v29 = vpack.i.bf16 %v1890_v0, %v1891_v21  ;;  %v412_v30 = vrot.slane %v5199_v18, 2 }
  0x24   : > { %v413_v31 = vrot.slane %v5201_v19, 2  ;;  %v4929_v32 = vpack.i.bf16 %v1893_v6, %v1894_v24  ;;  %v411_v33 = vsel %vm396_vm0, %v409_v22, %v410_v23  ;;  %v339_v34 = vrot.slane %v5199_v18, 1  ;;  %4818 = vmatpush3.bf16.msra.mxu1 %v5009_v37  ;;  %4786 = vmatpush3.bf16.msra.mxu0 %v5010_v38  ;;  %v288_v49 = vld [vmem:[%s5097_s7 + $0x3c] sm:$0x3] }
  0x25   : > { %v340_v35 = vrot.slane %v5201_v19, 1  ;;  %v338_v36 = vsel %vm323_vm1, %v336_v25, %v337_v26  ;;  %v4944_v39 = vpack.i.bf16 %v410_v23, %v411_v33  ;;  %v1895_v40 = vrot.slane %v5185_v2, 3  ;;  %4819 = vmatprep.subr.bf16.mxu1 %v6525_v1  ;;  %v5011_v25 = vld [vmem:[%s6518_s2 + $0x30] sm:$0xff]  }
  0x26   : > { %v5230_v41 = vunpack.c.l.bf16 %v285_v27  ;;  %v5232_v42 = vunpack.c.l.bf16 %v286_v28  ;;  %v4939_v43 = vpack.i.bf16 %v337_v26, %v338_v36  ;;  %v414_v44 = vsel %vm396_vm0, %v412_v30, %v413_v31  ;;  %v5012_v26 = vld [vmem:[%s6518_s2 + $0x38] sm:$0xff]  }
  0x27   : > { %4915 = vrot.lane.b32.xlu1 %v4914_v60, %s5033_s17  ;;  %4910 = vrot.lane.b32.xlu0 %v4909_v61, %s5033_s17  ;;  %v341_v45 = vsel %vm323_vm1, %v339_v34, %v340_v35  ;;  %v1896_v46 = vrot.slane %v5187_v3, 3  ;;  %v1898_v47 = vrot.slane %v5199_v18, 3  ;;  %v1899_v48 = vrot.slane %v5201_v19, 3 }
  0x28   : > { %6552 = vst [vmem:[#allocation10_spill] sm:$0xff] %v5230_v41  ;;  %v4954_v50 = vpack.i.bf16 %v413_v31, %v414_v44  ;;  %v4949_v51 = vpack.i.bf16 %v340_v35, %v341_v45  ;;  %v415_v53 = vrot.slane %v5230_v41, 2  ;;  %v416_v54 = vrot.slane %v5232_v42, 2  ;;  %4820 = vmatpush3.bf16.msra.mxu1 %v5011_v25 }
  0x29   : > { %v1897_v52 = vsel %vm1882_vm2, %v1895_v40, %v1896_v46  ;;  %v342_v55 = vrot.slane %v5230_v41, 1  ;;  %v1900_v56 = vsel %vm1882_vm2, %v1898_v47, %v1899_v48  ;;  %v343_v57 = vrot.slane %v5232_v42, 1  ;;  %4821 = vmatprep.subr.bf16.mxu1 %v6525_v1 }
  0x2a   : > { %v5255_v58 = vunpack.c.h.bf16 %v285_v27  ;;  %v5257_v59 = vunpack.c.l.bf16 %v288_v49  ;;  %v4964_v60 = vpack.i.bf16 %v1896_v46, %v1897_v52  ;;  %v4959_v61 = vpack.i.bf16 %v1899_v48, %v1900_v56 }
  0x2b   : > { %4925 = vrot.lane.b32.xlu1 %v4924_v13, %s5032_s16  ;;  %4920 = vrot.lane.b32.xlu0 %v4919_v20, %s5032_s16  ;;  %v1901_v62 = vrot.slane %v5230_v41, 3  ;;  %v1902_v63 = vrot.slane %v5232_v42, 3  ;;  %v417_v0 = vsel %vm396_vm0, %v415_v53, %v416_v54  ;;  %v344_v4 = vsel %vm323_vm1, %v342_v55, %v343_v57 }
  0x2c   : > { %v345_v5 = vrot.slane %v5255_v58, 1  ;;  %v346_v6 = vrot.slane %v5257_v59, 1  ;;  %v4974_v11 = vpack.i.bf16 %v416_v54, %v417_v0  ;;  %v4969_v12 = vpack.i.bf16 %v343_v57, %v344_v4  ;;  %4822 = vmatpush3.bf16.msra.mxu1 %v5012_v26 }
  0x2d   : > { %v1903_v13 = vsel %vm1882_vm2, %v1901_v62, %v1902_v63  ;;  %v418_v20 = vrot.slane %v5255_v58, 2  ;;  %v419_v22 = vrot.slane %v5257_v59, 2  ;;  %v1904_v23 = vrot.slane %v5255_v58, 3 }
  0x2e   : > { %v347_v21 = vsel %vm323_vm1, %v345_v5, %v346_v6  ;;  %v1905_v24 = vrot.slane %v5257_v59, 3  ;;  %v4984_v27 = vpack.i.bf16 %v1902_v63, %v1903_v13  ;;  %v6523_v33 = vmov 0  }
  0x2f   : > { %4935 = vrot.lane.b32.xlu1 %v4934_v29, %s5034_s24  ;;  %4930 = vrot.lane.b32.xlu0 %v4929_v32, %s5034_s24  ;;  %v4979_v28 = vpack.i.bf16 %v346_v6, %v347_v21  ;;  %v420_v29 = vsel %vm396_vm0, %v418_v20, %v419_v22  ;;  %v523_v34 = vlaneseq  ;;  %v5037_v35 = vmov 1966171168  }
  0x30   : > { %v1906_v30 = vsel %vm1882_vm2, %v1904_v23, %v1905_v24  ;;  %v4989_v31 = vpack.i.bf16 %v419_v22, %v420_v29  ;;  %4441 = vmatprep.subr.bf16.mxu0 %v6523_v33  ;;  %4843 = vmatprep.subr.bf16.mxu1 %v6523_v33  ;;  %v537_v36 = vunpack.c.l.s4 %v5037_v35  ;;  %v4253_v49 = vrot.slane %v5106_v7, 4 }
  0x31   : > { %v4994_v32 = vpack.i.bf16 %v1905_v24, %v1906_v30  ;;  %vm1878_vm0 = vcmask 1047559  }
  0x32   : > { %v538_v40 = vunpack.c.0.s8 %v537_v36 }
  0x33   : > { %4945 = vrot.lane.b32.xlu1 %v4944_v39, %s5032_s16  ;;  %4940 = vrot.lane.b32.xlu0 %v4939_v43, %s5033_s17  ;;  %v5292_v39 = vshrl.u32 %v523_v34, 7 }
  0x35   : > { %6553 = vst [vmem:[#allocation11_spill] sm:$0xff] %v5292_v39  ;;  %v5301_v53 = vsub.s32 %v538_v40, %v5292_v39 }
  0x37   : > { %4955 = vrot.lane.b32.xlu1 %v4954_v50, %s5032_s16  ;;  %4950 = vrot.lane.b32.xlu0 %v4949_v51, %s5033_s17  ;;  %v4254_v50 = vrot.slane %v5108_v8, 4 }
  0x39   : > { %v5312_v5 = vsel %vm4252_vm6, %v4253_v49, %v4254_v50 }
  0x3b   : > { %4965 = vrot.lane.b32.xlu1 %v4964_v60, %s5034_s24  ;;  %4960 = vrot.lane.b32.xlu0 %v4959_v61, %s5034_s24 }
  0x3f   : > { %4975 = vrot.lane.b32.xlu1 %v4974_v11, %s5032_s16  ;;  %4970 = vrot.lane.b32.xlu0 %v4969_v12, %s5033_s17 }
  0x43   : > { %4985 = vrot.lane.b32.xlu1 %v4984_v27, %s5034_s24  ;;  %4980 = vrot.lane.b32.xlu0 %v4979_v28, %s5033_s17 }
  0x47   : > { %4990 = vrot.lane.b32.xlu0 %v4989_v31, %s5032_s16  ;;  %4995 = vrot.lane.b32.xlu1 %v4994_v32, %s5034_s24  ;;  %s267_s16 = scalar_lea.vmem %s6521_s5, %s4653_s13 }
  0x8d   : > { %v4891_v37 = vpop.permute.xlu1 %4890  ;;  %v4881_v38 = vpop.permute.xlu0 %4880 }
  0x8e   : > { %v4893_v43 = vunpack.i.h.bf16 %v4891_v37  ;;  %v4892_v44 = vunpack.i.l.bf16 %v4891_v37  ;;  %v4883_v45 = vunpack.i.h.bf16 %v4881_v38  ;;  %v4882_v46 = vunpack.i.l.bf16 %v4881_v38 }
  0x90   : > { %v471_v47 = vsel %vm469_vm4, %v5108_v8, %v4883_v45  ;;  %v470_v48 = vsel %vm469_vm4, %v5106_v7, %v4882_v46  ;;  %v4256_v7 = vrot.slane %v5110_v9, 4  ;;  %v4257_v8 = vrot.slane %v5112_v10, 4 }
  0x91   : > { %v4896_v51 = vpop.permute.xlu1 %4895  ;;  %v4886_v52 = vpop.permute.xlu0 %4885  ;;  %v487_v54 = vsel %vm486_vm5, %v470_v48, %v4892_v44  ;;  %v488_v55 = vsel %vm486_vm5, %v471_v47, %v4893_v43 }
  0x92   : > { %v4898_v56 = vunpack.i.h.bf16 %v4896_v51  ;;  %v4897_v57 = vunpack.i.l.bf16 %v4896_v51  ;;  %v4888_v60 = vunpack.i.h.bf16 %v4886_v52  ;;  %v4887_v61 = vunpack.i.l.bf16 %v4886_v52 }
  0x93   : > { %v503_v62 = vpack.c.bf16 %v488_v55, %v487_v54  ;;  %v4655_v63 = vpack.c.bf16 %v488_v55, %v488_v55  ;;  %v5322_v27 = vsel %vm4252_vm6, %v4256_v7, %v4257_v8 }
  0x94   : > { %v473_v0 = vsel %vm469_vm4, %v5112_v10, %v4888_v60  ;;  %v472_v4 = vsel %vm469_vm4, %v5110_v9, %v4887_v61  ;;  %6554 = vst [vmem:[#allocation12_spill] sm:$0xff] %v5322_v27 }
  0x95   : > { %v4906_v6 = vpop.permute.xlu1 %4905  ;;  %v542_v11 = vrot.slane %v503_v62, %v5301_v53  ;;  %v4901_v12 = vpop.permute.xlu0 %4900  ;;  %v489_v13 = vsel %vm486_vm5, %v472_v4, %v4897_v57  ;;  %v490_v20 = vsel %vm486_vm5, %v473_v0, %v4898_v56  ;;  %v5319_v9 = vrot.slane %v4655_v63, %v5301_v53 }
  0x96   : > { %v4908_v22 = vunpack.i.h.bf16 %v4906_v6  ;;  %v4907_v23 = vunpack.i.l.bf16 %v4906_v6  ;;  %v4903_v10 = vunpack.i.h.bf16 %v4901_v12  ;;  %v4902_v24 = vunpack.i.l.bf16 %v4901_v12 }
  0x97   : > { %v550_v25 = vcombine.high %v542_v11, %v542_v11  ;;  %v504_v26 = vpack.c.bf16 %v490_v20, %v489_v13  ;;  %v4656_v30 = vpack.c.bf16 %v490_v20, %v490_v20  ;;  %v5332_v32 = vrot.slane %v542_v11, %v5301_v53 }
  0x98   : > { %v5325_v28 = vsel %vm1196_vm7, %v487_v54, %v4907_v23  ;;  %v1956_v29 = vsel %vm1196_vm7, %v488_v55, %v4908_v22  ;;  %v5329_v31 = vsel %vm1196_vm7, %v489_v13, %v4902_v24  ;;  %v1958_v43 = vsel %vm1196_vm7, %v490_v20, %v4903_v10 }
  0x99   : > { %6555 = vst [vmem:[#allocation13_spill] sm:$0xff] %v5325_v28  ;;  %6556 = vst [vmem:[#allocation14_spill] sm:$0xff] %v5329_v31  ;;  %v1971_v34 = vpack.c.bf16 %v1956_v29, %v5325_v28  ;;  %v4678_v35 = vpack.c.bf16 %v1956_v29, %v1956_v29  ;;  %v581_v36 = vrot.slane %v504_v26, %v5301_v53  ;;  %v4916_v37 = vpop.permute.xlu1 %4915  ;;  %v4911_v38 = vpop.permute.xlu0 %4910 }
  0x9a   : > { %v5337_v40 = vrot.slane %v4656_v30, %v5301_v53  ;;  %v4918_v45 = vunpack.i.h.bf16 %v4916_v37  ;;  %v564_v46 = vrot.slane %v5319_v9, %v5301_v53  ;;  %v5349_v50 = vrot.slane %v550_v25, %v5301_v53 }
  0x9b   : > { %v2014_v47 = vrot.slane %v1971_v34, %v5301_v53  ;;  %v5346_v48 = vrot.slane %v4678_v35, %v5301_v53  ;;  %v589_v49 = vcombine.high %v581_v36, %v581_v36  ;;  %v5352_v51 = vrot.slane %v581_v36, %v5301_v53 }
  0x9c   : > { %v1972_v52 = vpack.c.bf16 %v1958_v43, %v5329_v31  ;;  %v4679_v54 = vpack.c.bf16 %v1958_v43, %v1958_v43  ;;  %v477_v60 = vsel %vm469_vm4, %v5119_v15, %v4918_v45  ;;  %v4917_v0 = vunpack.i.l.bf16 %v4916_v37 }
  0x9d   : > { %v2022_v55 = vcombine.high %v2014_v47, %v2014_v47  ;;  %v5356_v56 = vrot.slane %v2014_v47, %v5301_v53  ;;  %v4926_v61 = vpop.permute.xlu1 %4925  ;;  %v4921_v62 = vpop.permute.xlu0 %4920  ;;  %v5369_v4 = vrot.slane %v589_v49, %v5301_v53  ;;  %v4913_v6 = vunpack.i.h.bf16 %v4911_v38 }
  0x9e   : > { %v2053_v7 = vrot.slane %v1972_v52, %v5301_v53  ;;  %v5366_v8 = vrot.slane %v4679_v54, %v5301_v53  ;;  %v4912_v11 = vunpack.i.l.bf16 %v4911_v38  ;;  %v4928_v12 = vunpack.i.h.bf16 %v4926_v61 }
  0x9f   : > { %v5372_v13 = vrot.slane %v2022_v55, %v5301_v53  ;;  %v611_v20 = vcombine.high %v5352_v51, %v5352_v51  ;;  %v476_v24 = vsel %vm469_vm4, %v5117_v14, %v4917_v0  ;;  %v4927_v25 = vunpack.i.l.bf16 %v4926_v61 }
  0xa0   : > { %v2061_v22 = vcombine.high %v2053_v7, %v2053_v7  ;;  %v5377_v23 = vrot.slane %v2053_v7, %v5301_v53  ;;  %v2075_v10 = vrot.slane %v5366_v8, %v5301_v53  ;;  %v494_v26 = vsel %vm486_vm5, %v477_v60, %v4928_v12 }
  0xa1   : > { %v4936_v29 = vpop.permute.xlu1 %4935  ;;  %v475_v34 = vsel %vm469_vm4, %v5123_v17, %v4913_v6  ;;  %v474_v35 = vsel %vm469_vm4, %v5121_v16, %v4912_v11  ;;  %v4658_v36 = vpack.c.bf16 %v494_v26, %v494_v26  ;;  %v4931_v37 = vpop.permute.xlu0 %4930  ;;  %v493_v38 = vsel %vm486_vm5, %v476_v24, %v4927_v25 }
  0xa2   : > { %v5385_v30 = vrot.slane %v2061_v22, %v5301_v53  ;;  %v4923_v43 = vunpack.i.h.bf16 %v4921_v62  ;;  %v4922_v45 = vunpack.i.l.bf16 %v4921_v62  ;;  %v4938_v47 = vunpack.i.h.bf16 %v4936_v29 }
  0xa3   : > { %v5394_v49 = vcombine.high %v5377_v23, %v5377_v23  ;;  %v506_v54 = vpack.c.bf16 %v494_v26, %v493_v38  ;;  %v4937_v55 = vunpack.i.l.bf16 %v4936_v29  ;;  %v4933_v8 = vunpack.i.h.bf16 %v4931_v37 }
  0xa4   : > { %v5398_v52 = vcombine.high %v5385_v30, %v5385_v30  ;;  %v491_v61 = vsel %vm486_vm5, %v474_v35, %v4922_v45  ;;  %v492_v7 = vsel %vm486_vm5, %v475_v34, %v4923_v43  ;;  %v666_v0 = vrot.slane %v4658_v36, %v5301_v53 }
  0xa5   : > { %v659_v62 = vrot.slane %v506_v54, %v5301_v53  ;;  %v505_v6 = vpack.c.bf16 %v492_v7, %v491_v61  ;;  %v4932_v11 = vunpack.i.l.bf16 %v4931_v37  ;;  %v4657_v12 = vpack.c.bf16 %v492_v7, %v492_v7  ;;  %v5410_v29 = vpop.permute.xlu1 %4945 }
  0xa6   : > { %v5406_v22 = vsel %vm1196_vm7, %v491_v61, %v4937_v55  ;;  %v1960_v24 = vsel %vm1196_vm7, %v492_v7, %v4938_v47  ;;  %v1962_v25 = vsel %vm1196_vm7, %v494_v26, %v4933_v8  ;;  %v2335_v35 = vunpack.i.h.s16 %v5398_v52  ;;  %v4941_v61 = vpop.permute.xlu0 %4940 }
  0xa7   : > { %6557 = vst [vmem:[#allocation15_spill] sm:$0xff] %v5406_v22  ;;  %v667_v34 = vcombine.high %v659_v62, %v659_v62  ;;  %v674_v43 = vrot.slane %v659_v62, %v5301_v53  ;;  %v620_v45 = vrot.slane %v505_v6, %v5301_v53  ;;  %v627_v36 = vrot.slane %v4657_v12, %v5301_v53 }
  0xa8   : > { %v1973_v37 = vpack.c.bf16 %v1960_v24, %v5406_v22  ;;  %v4680_v54 = vpack.c.bf16 %v1960_v24, %v1960_v24  ;;  %v4681_v55 = vpack.c.bf16 %v1962_v25, %v1962_v25  ;;  %v681_v47 = vrot.slane %v666_v0, %v5301_v53 }
  0xa9   : > { %v688_v26 = vrot.slane %v667_v34, %v5301_v53  ;;  %v689_v7 = vcombine.high %v674_v43, %v674_v43  ;;  %v628_v8 = vcombine.high %v620_v45, %v620_v45  ;;  %v642_v44 = vrot.slane %v627_v36, %v5301_v53 }
  0xaa   : > { %v2092_v21 = vrot.slane %v1973_v37, %v5301_v53  ;;  %v5422_v62 = vrot.slane %v4680_v54, %v5301_v53  ;;  %v5425_v6 = vrot.slane %v4681_v55, %v5301_v53  ;;  %v5428_v24 = vrot.slane %v620_v45, %v5301_v53  ;;  %v4956_v55 = vpop.permute.xlu1 %4955 }
  0xab   : > { %v690_v12 = vcombine.high %v688_v26, %v688_v26  ;;  %v5431_v0 = vrot.slane %v628_v8, %v5301_v53  ;;  %v5434_v34 = vsel %vm1196_vm7, %v493_v38, %v4932_v11  ;;  %v5436_v57 = vpack.i.b16 %v2075_v10, %v2335_v35 }
  0xac   : > { %6558 = vst [vmem:[#allocation16_spill] sm:$0xff] %v5434_v34  ;;  %v5438_v36 = vcombine.low %v688_v26, %v689_v7  ;;  %v2100_v37 = vcombine.high %v2092_v21, %v2092_v21  ;;  %v5441_v54 = vrot.slane %v2092_v21, %v5301_v53  ;;  %v5447_v63 = vcombine.low %v642_v44, %v674_v43 }
  0xad   : > { %v5443_v60 = vcombine.low %v690_v12, %v681_v47  ;;  %v2153_v21 = vrot.slane %v5425_v6, %v5301_v53  ;;  %v1974_v35 = vpack.c.bf16 %v1962_v25, %v5434_v34  ;;  %v4951_v47 = vpop.permute.xlu0 %4950  ;;  %v4943_v44 = vunpack.i.h.bf16 %v4941_v61 }
  0xae   : > { %v5454_v11 = vrot.slane %v2100_v37, %v5301_v53  ;;  %v4942_v43 = vunpack.i.l.bf16 %v4941_v61  ;;  %v865_v7 = vcombine.low %v5332_v32, %v5349_v50  ;;  %v4663_v12 = vcombine.high %v5332_v32, %v5349_v50  ;;  %v4966_v38 = vpop.permute.xlu1 %4965 }
  0xaf   : > { %v2131_v8 = vrot.slane %v1974_v35, %v5301_v53  ;;  %v867_v6 = vcombine.low %v564_v46, %v5352_v51  ;;  %v868_v25 = vcombine.low %v5369_v4, %v611_v20  ;;  %v4948_v61 = vunpack.i.h.bf16 %v5410_v29 }
  0xb0   : > { %v4947_v37 = vunpack.i.l.bf16 %v5410_v29  ;;  %v479_v35 = vsel %vm469_vm4, %v5187_v3, %v4943_v44  ;;  %v875_v26 = vrot.slane %v865_v7, %v5301_v53  ;;  %v478_v50 = vsel %vm469_vm4, %v5185_v2, %v4942_v43 }
  0xb1   : > { %v2139_v32 = vcombine.high %v2131_v8, %v2131_v8  ;;  %v882_v9 = vrot.slane %v4663_v12, %v5301_v53  ;;  %v4958_v46 = vunpack.i.h.bf16 %v4956_v55  ;;  %v889_v51 = vrot.slane %v867_v6, %v5301_v53  ;;  %v4961_v1 = vpop.permute.xlu0 %4960 }
  0xb2   : > { %v896_v20 = vrot.slane %v868_v25, %v5301_v53  ;;  %v4953_v10 = vunpack.i.h.bf16 %v4951_v47  ;;  %v4952_v45 = vunpack.i.l.bf16 %v4951_v47  ;;  %v5485_v29 = vrot.slane %v2131_v8, %v5301_v53 }
  0xb3   : > { %v5488_v44 = vrot.slane %v2139_v32, %v5301_v53  ;;  %v897_v7 = vcombine.low %v875_v26, %v882_v9  ;;  %v4957_v33 = vunpack.i.l.bf16 %v4956_v55  ;;  %v4968_v39 = vunpack.i.h.bf16 %v4966_v38 }
  0xb4   : > { %v898_v43 = vcombine.low %v889_v51, %v896_v20  ;;  %v481_v12 = vsel %vm469_vm4, %v5201_v19, %v4953_v10  ;;  %v480_v6 = vsel %vm469_vm4, %v5199_v18, %v4952_v45  ;;  %v4967_v25 = vunpack.i.l.bf16 %v4966_v38 }
  0xb5   : > { %v5496_v47 = vcombine.high %v5488_v44, %v5488_v44  ;;  %v905_v8 = vrot.slane %v897_v7, %v5301_v53  ;;  %v495_v32 = vsel %vm486_vm5, %v478_v50, %v4947_v37  ;;  %v496_v26 = vsel %vm486_vm5, %v479_v35, %v4948_v61  ;;  %v5512_v61 = vld [vmem:[%s6519_s3] sm:$0xff]  }
  0xb6   : > { %v912_v55 = vrot.slane %v898_v43, %v5301_v53  ;;  %v4963_v9 = vunpack.i.h.bf16 %v4961_v1  ;;  %v4962_v51 = vunpack.i.l.bf16 %v4961_v1  ;;  %v507_v20 = vpack.c.bf16 %v496_v26, %v495_v32 }
  0xb7   : > { %v2353_v10 = vunpack.i.h.s16 %v5496_v47  ;;  %v4659_v45 = vpack.c.bf16 %v496_v26, %v496_v26  ;;  %v5504_v34 = vsel %vm1196_vm7, %v495_v32, %v4967_v25  ;;  %v1964_v28 = vsel %vm1196_vm7, %v496_v26, %v4968_v39 }
  0xb8   : > { %6559 = vst [vmem:[#allocation17_spill] sm:$0xff] %v5504_v34  ;;  %v913_v22 = vcombine.low %v905_v8, %v912_v55  ;;  %v497_v38 = vsel %vm486_vm5, %v480_v6, %v4957_v33  ;;  %v498_v37 = vsel %vm486_vm5, %v481_v12, %v4958_v46  ;;  %v5516_v1 = vcombine.high %v5485_v29, %v5485_v29 }
  0xb9   : > { %v698_v35 = vrot.slane %v507_v20, %v5301_v53  ;;  %v5520_v50 = vrot.slane %v4659_v45, %v5301_v53  ;;  %v1975_v39 = vpack.c.bf16 %v1964_v28, %v5504_v34  ;;  %v4682_v33 = vpack.c.bf16 %v1964_v28, %v1964_v28  ;;  %v4971_v34 = vpop.permute.xlu0 %4970 }
  0xba   : > { %4788 = vmatmul.mubr.msk.bf16.vlgmr.msra.gmra.mrb[0].mxu0 %vm1196_vm7, %v913_v22  ;;  %v508_v46 = vpack.c.bf16 %v498_v37, %v497_v38  ;;  %v4660_v7 = vpack.c.bf16 %v498_v37, %v498_v37  ;;  %v5525_v43 = vsel %vm1196_vm7, %v497_v38, %v4962_v51  ;;  %v5528_v6 = vpack.i.b16 %v2153_v21, %v2353_v10  ;;  %v5545_v21 = vld [vmem:[%s6519_s3 + $0x8] sm:$0xff]  }
  0xbb   : > { %6560 = vst [vmem:[#allocation18_spill] sm:$0xff] %v5525_v43  ;;  %v706_v8 = vcombine.high %v698_v35, %v698_v35  ;;  %v2170_v25 = vrot.slane %v1975_v39, %v5301_v53  ;;  %v6561_v32 = vmov 0.0   ;;  %v5534_v55 = vrot.slane %v4682_v33, %v5301_v53  ;;  %4442 = vmatpush1.bf16.msra.mxu0 %v5512_v61 }
  0xbc   : > { %4791 = vmatprep.mubr.msk.bf16.mxu0 %vm5035_vm3, %v6561_v32  ;;  %v737_v28 = vrot.slane %v508_v46, %v5301_v53  ;;  %v5538_v22 = vrot.slane %v4660_v7, %v5301_v53  ;;  %v1966_v26 = vsel %vm1196_vm7, %v498_v37, %v4963_v9  ;;  %v5548_v51 = vrot.slane %v698_v35, %v5301_v53 }
  0xbd   : > { %v2178_v20 = vcombine.high %v2170_v25, %v2170_v25  ;;  %v1976_v45 = vpack.c.bf16 %v1966_v26, %v5525_v43  ;;  %v6562_v38 = vmov 0   ;;  %v5555_v9 = vrot.slane %v706_v8, %v5301_v53  ;;  %v4976_v43 = vpop.permute.xlu1 %4975 }
  0xbe   : > { %4443 = vmatprep.subr.bf16.mxu0 %v6562_v38  ;;  %v5558_v37 = vrot.slane %v2170_v25, %v5301_v53  ;;  %v745_v33 = vcombine.high %v737_v28, %v737_v28  ;;  %v5563_v35 = vrot.slane %v737_v28, %v5301_v53  ;;  %v4683_v46 = vpack.c.bf16 %v1966_v26, %v1966_v26  ;;  %v5580_v28 = vld [vmem:[%s6519_s3 + $0x10] sm:$0xff]  }
  0xbf   : > { %v2209_v7 = vrot.slane %v1976_v45, %v5301_v53  ;;  %v2331_v10 = vunpack.i.h.s16 %v5385_v30  ;;  %v5568_v12 = vrot.slane %v2178_v20, %v5301_v53  ;;  %v2333_v39 = vunpack.i.h.s16 %v5394_v49  ;;  %4444 = vmatpush1.bf16.msra.mxu0 %v5545_v21 }
  0xc0   : > { %v5573_v25 = vrot.slane %v745_v33, %v5301_v53  ;;  %v5583_v26 = vrot.slane %v4683_v46, %v5301_v53  ;;  %v6563_v45 = vrot.slane %v5346_v48, %v5301_v53  ;;  %v6564_v8 = vunpack.i.h.s16 %v5377_v23  ;;  %4445 = vmatprep.subr.bf16.mxu0 %v6562_v38 }
  0xc1   : > { %v2217_v20 = vcombine.high %v2209_v7, %v2209_v7  ;;  %v4688_v19 = vpack.i.b16 %v5394_v49, %v2331_v10  ;;  %v4689_v18 = vpack.i.b16 %v5398_v52, %v2333_v39  ;;  %v2477_v46 = vcombine.low %v5356_v56, %v5372_v13 }
  0xc2   : > { %v4686_v33 = vpack.i.b16 %v5377_v23, %v6563_v45  ;;  %v4687_v31 = vpack.i.b16 %v5385_v30, %v6564_v8  ;;  %v4706_v3 = vcombine.high %v5356_v56, %v5372_v13  ;;  %v5602_v45 = vrot.slane %v2209_v7, %v5301_v53  ;;  %v5615_v56 = vld [vmem:[%s6519_s3 + $0x18] sm:$0xff]  }
  0xc3   : > { %v2231_v23 = vrot.slane %v5583_v26, %v5301_v53  ;;  %v5607_v30 = vrot.slane %v2217_v20, %v5301_v53  ;;  %v2480_v52 = vcombine.low %v4688_v19, %v4689_v18  ;;  %v2487_v10 = vrot.slane %v2477_v46, %v5301_v53  ;;  %4446 = vmatpush1.bf16.msra.mxu0 %v5580_v28  ;;  %v4986_v20 = vpop.permute.xlu1 %4985 }
  0xc4   : > { %v2479_v49 = vcombine.low %v4686_v33, %v4687_v31  ;;  %v2494_v39 = vrot.slane %v4706_v3, %v5301_v53  ;;  %v4978_v7 = vunpack.i.h.bf16 %v4976_v43  ;;  %v4977_v8 = vunpack.i.l.bf16 %v4976_v43  ;;  %4447 = vmatprep.subr.bf16.mxu0 %v6562_v38  ;;  %v4981_v33 = vpop.permute.xlu0 %4980 }
  0xc5   : > { %v5619_v13 = vcombine.high %v5607_v30, %v5607_v30  ;;  %v4973_v26 = vunpack.i.h.bf16 %v4971_v34  ;;  %v2508_v3 = vrot.slane %v2480_v52, %v5301_v53  ;;  %v4972_v31 = vunpack.i.l.bf16 %v4971_v34 }
  0xc6   : > { %v2501_v18 = vrot.slane %v2479_v49, %v5301_v53  ;;  %v2509_v19 = vcombine.low %v2487_v10, %v2494_v39  ;;  %v5626_v46 = vcombine.high %v5602_v45, %v5602_v45  ;;  %v612_v2 = vcombine.high %v5369_v4, %v5369_v4  ;;  %v5647_v4 = vld [vmem:[%s6519_s3 + $0x20] sm:$0xff]  }
  0xc7   : > { %v2371_v48 = vunpack.i.h.s16 %v5619_v13  ;;  %v483_v43 = vsel %vm469_vm4, %v5232_v42, %v4973_v26  ;;  %v482_v49 = vsel %vm469_vm4, %v5230_v41, %v4972_v31  ;;  %v6565_v34 = vcombine.low %v5428_v24, %v5431_v0  ;;  %4448 = vmatpush1.bf16.msra.mxu0 %v5615_v56 }
  0xc8   : > { %v2510_v15 = vcombine.low %v2501_v18, %v2508_v3  ;;  %v6566_v10 = vcombine.high %v5428_v24, %v5431_v0  ;;  %v2517_v26 = vrot.slane %v2509_v19, %v5301_v53  ;;  %v6567_v18 = vrot.slane %v5337_v40, %v5301_v53  ;;  %4449 = vmatprep.subr.bf16.mxu0 %v6562_v38  ;;  %v4991_v27 = vpop.permute.xlu0 %4990 }
  0xc9   : > { %v931_v52 = vrot.slane %v6565_v34, %v5301_v53  ;;  %v945_v31 = vrot.slane %v5447_v63, %v5301_v53  ;;  %v4988_v34 = vunpack.i.h.bf16 %v4986_v20  ;;  %v4987_v0 = vunpack.i.l.bf16 %v4986_v20 }
  0xca   : > { %v938_v39 = vrot.slane %v6566_v10, %v5301_v53  ;;  %v914_v3 = vcombine.low %v612_v2, %v6567_v18  ;;  %v2524_v24 = vrot.slane %v2510_v15, %v5301_v53  ;;  %v499_v10 = vsel %vm486_vm5, %v482_v49, %v4977_v8  ;;  %v5668_v15 = vld [vmem:[%s6519_s3 + $0x28] sm:$0xff]  }
  0xcb   : > { %v500_v41 = vsel %vm486_vm5, %v483_v43, %v4978_v7  ;;  %v5661_v2 = vsel %vm1196_vm7, %v499_v10, %v4987_v0  ;;  %v4983_v18 = vunpack.i.h.bf16 %v4981_v33  ;;  %4450 = vmatpush1.bf16.msra.mxu0 %v5647_v4  ;;  %v2365_v7 = vunpack.i.h.s16 %v5602_v45 }
  0xcc   : > { %v924_v14 = vrot.slane %v914_v3, %v5301_v53  ;;  %v947_v19 = vcombine.low %v938_v39, %v945_v31  ;;  %v509_v17 = vpack.c.bf16 %v500_v41, %v499_v10  ;;  %v4661_v16 = vpack.c.bf16 %v500_v41, %v500_v41  ;;  %4451 = vmatprep.subr.bf16.mxu0 %v6562_v38 }
  0xcd   : > { %v2525_v40 = vcombine.low %v2517_v26, %v2524_v24  ;;  %v1968_v63 = vsel %vm1196_vm7, %v500_v41, %v4988_v34  ;;  %v5674_v49 = vpack.i.b16 %v2231_v23, %v2371_v48  ;;  %v4982_v26 = vunpack.i.l.bf16 %v4981_v33  ;;  %v4996_v33 = vpop.permute.xlu1 %4995 }
  0xce   : > { %v946_v8 = vcombine.low %v924_v14, %v931_v52  ;;  %v961_v20 = vrot.slane %v947_v19, %v5301_v53  ;;  %v776_v43 = vrot.slane %v509_v17, %v5301_v53  ;;  %v1977_v41 = vpack.c.bf16 %v1968_v63, %v5661_v2 }
  0xcf   : > { %4824 = vmatmul.mubr.bf16.vlgmr.msra.gmra.mrb[0].mxu1 %v2525_v40  ;;  %v4684_v39 = vpack.c.bf16 %v1968_v63, %v1968_v63  ;;  %v783_v31 = vrot.slane %v4661_v16, %v5301_v53  ;;  %v4993_v24 = vunpack.i.h.bf16 %v4991_v27  ;;  %v485_v48 = vsel %vm469_vm4, %v5257_v59, %v4983_v18  ;;  %4452 = vmatpush1.bf16.msra.mxu0 %v5668_v15 }
  0xd0   : > { %v954_v3 = vrot.slane %v946_v8, %v5301_v53  ;;  %v784_v34 = vcombine.high %v776_v43, %v776_v43  ;;  %4853 = vmatpush1.bf16.msra.mxu1 %v5512_v61  ;;  %4827 = vmatprep.mubr.msk.bf16.mxu1 %vm5035_vm3, %v6561_v32  ;;  %v2248_v14 = vrot.slane %v1977_v41, %v5301_v53  ;;  %v4992_v23 = vunpack.i.l.bf16 %v4991_v27  ;;  %v5700_v27 = vld [vmem:[%s6519_s3 + $0x30] sm:$0xff]  }
  0xd1   : > { %v5684_v17 = vrot.slane %v4684_v39, %v5301_v53  ;;  %4844 = vmatprep.subr.bf16.mxu1 %v6562_v38  ;;  %v5691_v61 = vrot.slane %v776_v43, %v5301_v53  ;;  %v484_v52 = vsel %vm469_vm4, %v5255_v58, %v4982_v26  ;;  %v502_v0 = vsel %vm486_vm5, %v485_v48, %v4993_v24 }
  0xd2   : > { %v962_v16 = vcombine.low %v954_v3, %v961_v20  ;;  %4453 = vmatprep.subr.bf16.mxu0 %v6562_v38  ;;  %v5703_v10 = vrot.slane %v784_v34, %v5301_v53  ;;  %v2256_v19 = vcombine.high %v2248_v14, %v2248_v14  ;;  %v5706_v40 = vrot.slane %v2248_v14, %v5301_v53 }
  0xd3   : > { %v501_v63 = vsel %vm486_vm5, %v484_v52, %v4992_v23  ;;  %v4662_v8 = vpack.c.bf16 %v502_v0, %v502_v0  ;;  %v4998_v20 = vunpack.i.h.bf16 %v4996_v33  ;;  %v4997_v43 = vunpack.i.l.bf16 %v4996_v33  ;;  %4454 = vmatpush1.bf16.msra.mxu0 %v5700_v27 }
  0xd4   : > { %4792 = vmatmul.mubr.msk.bf16.gmra.mrb[4].mxu0 %vm1196_vm7, %v962_v16  ;;  %v510_v18 = vpack.c.bf16 %v502_v0, %v501_v63  ;;  %4854 = vmatpush1.bf16.msra.mxu1 %v5545_v21  ;;  %v2270_v41 = vrot.slane %v5684_v17, %v5301_v53  ;;  %v5714_v39 = vrot.slane %v2256_v19, %v5301_v53  ;;  %v2349_v3 = vunpack.i.h.s16 %v5488_v44 }
  0xd5   : > { %v798_v26 = vrot.slane %v783_v31, %v5301_v53  ;;  %4795 = vmatprep.mubr.msk.bf16.mxu0 %vm5035_vm3, %v6561_v32  ;;  %4845 = vmatprep.subr.bf16.mxu1 %v6562_v38  ;;  %v822_v24 = vrot.slane %v4662_v8, %v5301_v53  ;;  %v5724_v21 = vsel %vm1196_vm7, %v501_v63, %v4997_v43  ;;  %v5731_v31 = vld [vmem:[%s6519_s3 + $0x38] sm:$0xff]  }
  0xd6   : > { %v815_v34 = vrot.slane %v510_v18, %v5301_v53  ;;  %v1970_v14 = vsel %vm1196_vm7, %v502_v0, %v4998_v20  ;;  %v2278_v48 = vcombine.high %v5706_v40, %v5706_v40  ;;  %v2123_v16 = vcombine.high %v5454_v11, %v5454_v11  ;;  %4455 = vmatprep.subr.bf16.mxu0 %v6562_v38 }
  0xd7   : > { %v1978_v23 = vpack.c.bf16 %v1970_v14, %v5724_v21  ;;  %v4685_v33 = vpack.c.bf16 %v1970_v14, %v1970_v14  ;;  %v837_v19 = vrot.slane %v822_v24, %v5301_v53  ;;  %v6568_v63 = vrot.slane %v5422_v62, %v5301_v53  ;;  %4456 = vmatpush1.bf16.msra.mxu0 %v5731_v31 }
  0xd8   : > { %v823_v52 = vcombine.high %v815_v34, %v815_v34  ;;  %v830_v0 = vrot.slane %v815_v34, %v5301_v53  ;;  %4855 = vmatpush1.bf16.msra.mxu1 %v5580_v28  ;;  %v6569_v20 = vunpack.i.h.s16 %v5485_v29  ;;  %v4693_v14 = vpack.i.b16 %v5516_v1, %v2349_v3  ;;  %4457 = vmatprep.subr.bf16.mxu0 %v6562_v38 }
  0xd9   : > { %v4691_v18 = vpack.i.b16 %v5485_v29, %v6568_v63  ;;  %v2287_v8 = vrot.slane %v1978_v23, %v5301_v53  ;;  %v2526_v34 = vcombine.low %v5436_v57, %v5441_v54  ;;  %4846 = vmatprep.subr.bf16.mxu1 %v6562_v38  ;;  %v5756_v63 = vrot.slane %v4685_v33, %v5301_v53 }
  0xda   : > { %v4692_v43 = vpack.i.b16 %v5488_v44, %v6569_v20  ;;  %v844_v24 = vrot.slane %v823_v52, %v5301_v53  ;;  %v845_v62 = vcombine.high %v830_v0, %v830_v0  ;;  %v6570_v28 = vcombine.high %v5441_v54, %v5441_v54  ;;  %v5766_v44 = vld [vmem:[%s6519_s3 + $0x40] sm:$0xff]  }
  0xdb   : > { %v5768_v57 = vcombine.low %v798_v26, %v830_v0  ;;  %v2295_v3 = vcombine.high %v2287_v8, %v2287_v8  ;;  %v5771_v23 = vrot.slane %v2287_v8, %v5301_v53  ;;  %v2528_v33 = vcombine.low %v2123_v16, %v4691_v18  ;;  %4458 = vmatpush1.bf16.msra.mxu0 %v5766_v44 }
  0xdc   : > { %v2527_v29 = vcombine.low %v5454_v11, %v6570_v28  ;;  %v846_v52 = vcombine.high %v844_v24, %v844_v24  ;;  %v5774_v54 = vcombine.low %v844_v24, %v845_v62  ;;  %v2529_v11 = vcombine.low %v4692_v43, %v4693_v14  ;;  %4856 = vmatpush1.bf16.msra.mxu1 %v5615_v56  ;;  %v5797_v14 = vld [vmem:[%s6519_s3 + $0x48] sm:$0xff]  }
  0xdd   : > { %v2536_v20 = vrot.slane %v2526_v34, %v5301_v53  ;;  %v5779_v28 = vrot.slane %v2295_v3, %v5301_v53  ;;  %v2550_v0 = vrot.slane %v2528_v33, %v5301_v53  ;;  %v965_v16 = vcombine.low %v5548_v51, %v5555_v9  ;;  %4847 = vmatprep.subr.bf16.mxu1 %v6562_v38 }
  0xde   : > { %v2543_v26 = vrot.slane %v2527_v29, %v5301_v53  ;;  %v5786_v18 = vcombine.low %v846_v52, %v837_v19  ;;  %v2557_v8 = vrot.slane %v2529_v11, %v5301_v53  ;;  %v4665_v43 = vcombine.high %v5548_v51, %v5555_v9  ;;  %4459 = vmatprep.subr.bf16.mxu0 %v6562_v38 }
  0xdf   : > { %v973_v56 = vrot.slane %v5438_v36, %v5301_v53  ;;  %v980_v19 = vrot.slane %v5443_v60, %v5301_v53  ;;  %v987_v24 = vrot.slane %v965_v16, %v5301_v53  ;;  %v2351_v62 = vunpack.i.h.s16 %v5516_v1  ;;  %4460 = vmatpush1.bf16.msra.mxu0 %v5797_v14 }
  0xe0   : > { %v2558_v34 = vcombine.low %v2536_v20, %v2543_v26  ;;  %v2559_v51 = vcombine.low %v2550_v0, %v2557_v8  ;;  %v994_v36 = vrot.slane %v4665_v43, %v5301_v53  ;;  %v6571_v9 = vrot.slane %v5534_v55, %v5301_v53  ;;  %4857 = vmatpush1.bf16.msra.mxu1 %v5647_v4 }
  0xe1   : > { %v4697_v3 = vpack.i.b16 %v5607_v30, %v2365_v7  ;;  %v995_v33 = vcombine.low %v973_v56, %v980_v19  ;;  %v4694_v1 = vpack.i.b16 %v5496_v47, %v2351_v62  ;;  %v2576_v52 = vcombine.low %v5558_v37, %v5568_v12  ;;  %4848 = vmatprep.subr.bf16.mxu1 %v6562_v38 }
  0xe2   : > { %v4696_v29 = vpack.i.b16 %v5602_v45, %v6571_v9  ;;  %v2566_v60 = vrot.slane %v2558_v34, %v5301_v53  ;;  %v2573_v55 = vrot.slane %v2559_v51, %v5301_v53  ;;  %v996_v11 = vcombine.low %v987_v24, %v994_v36 }
  0xe3   : > { %v4707_v45 = vcombine.high %v5558_v37, %v5568_v12  ;;  %v1003_v4 = vrot.slane %v995_v33, %v5301_v53  ;;  %v2575_v7 = vcombine.low %v4694_v1, %v5528_v6  ;;  %v2592_v47 = vrot.slane %v2576_v52, %v5301_v53 }
  0xe4   : > { %v2578_v20 = vcombine.low %v4696_v29, %v4697_v3  ;;  %v768_v26 = vcombine.high %v5573_v25, %v5573_v25  ;;  %v2574_v0 = vcombine.low %v2566_v60, %v2573_v55  ;;  %v1010_v16 = vrot.slane %v996_v11, %v5301_v53  ;;  %4858 = vmatpush1.bf16.msra.mxu1 %v5668_v15 }
  0xe5   : > { %v2599_v8 = vrot.slane %v4707_v45, %v5301_v53  ;;  %v2585_v12 = vrot.slane %v2575_v7, %v5301_v53  ;;  %v6572_v6 = vrot.slane %v5520_v50, %v5301_v53  ;;  %v6573_v56 = vcombine.high %v5563_v35, %v5563_v35  ;;  %4849 = vmatprep.subr.bf16.mxu1 %v6562_v38 }
  0xe6   : > { %v2606_v43 = vrot.slane %v2578_v20, %v5301_v53  ;;  %v6574_v19 = vrot.slane %v5538_v22, %v5301_v53  ;;  %4828 = vmatmul.mubr.bf16.gmra.mrb[4].mxu1 %v2574_v0  ;;  %v1011_v15 = vcombine.low %v1003_v4, %v1010_v16  ;;  %v1015_v51 = vcombine.low %v5691_v61, %v5703_v10 }
  0xe7   : > { %v1012_v37 = vcombine.low %v6572_v6, %v5563_v35  ;;  %v1013_v34 = vcombine.low %v5573_v25, %v6573_v56  ;;  %v2279_v50 = vcombine.high %v5714_v39, %v5714_v39  ;;  %4831 = vmatprep.mubr.msk.bf16.mxu1 %vm5035_vm3, %v6561_v32  ;;  %v2607_v35 = vcombine.low %v2585_v12, %v2592_v47 }
  0xe8   : > { %v1014_v24 = vcombine.low %v768_v26, %v6574_v19  ;;  %v2608_v62 = vcombine.low %v2599_v8, %v2606_v43  ;;  %4796 = vmatmul.mubr.msk.bf16.gmra.mrb[8].mxu0 %vm1196_vm7, %v1011_v15  ;;  %v1043_v29 = vrot.slane %v1015_v51, %v5301_v53  ;;  %v2367_v3 = vunpack.i.h.s16 %v5607_v30  ;;  %4859 = vmatpush1.bf16.msra.mxu1 %v5700_v27 }
  0xe9   : > { %v1022_v25 = vrot.slane %v1012_v37, %v5301_v53  ;;  %v1029_v22 = vrot.slane %v1013_v34, %v5301_v53  ;;  %v2369_v60 = vunpack.i.h.s16 %v5626_v46  ;;  %v2615_v33 = vrot.slane %v2607_v35, %v5301_v53  ;;  %4799 = vmatprep.mubr.msk.bf16.mxu0 %vm5035_vm3, %v6561_v32  ;;  %4850 = vmatprep.subr.bf16.mxu1 %v6562_v38 }
  0xea   : > { %v1036_v36 = vrot.slane %v1014_v24, %v5301_v53  ;;  %v2622_v9 = vrot.slane %v2608_v62, %v5301_v53  ;;  %v4701_v52 = vpack.i.b16 %v5771_v23, %v2270_v41  ;;  %v2625_v55 = vcombine.low %v5674_v49, %v5706_v40 }
  0xeb   : > { %v1044_v1 = vcombine.low %v1022_v25, %v1029_v22  ;;  %v4698_v30 = vpack.i.b16 %v5626_v46, %v2367_v3  ;;  %v4699_v45 = vpack.i.b16 %v5619_v13, %v2369_v60  ;;  %v2626_v27 = vcombine.low %v5714_v39, %v2278_v48  ;;  %v6577_v3 = vld [vmem:[#allocation5_spill] sm:$0xff] }
  0xec   : > { %v1045_v11 = vcombine.low %v1036_v36, %v1043_v29  ;;  %v2623_v20 = vcombine.low %v2615_v33, %v2622_v9  ;;  %v2627_v4 = vcombine.low %v2279_v50, %v4701_v52  ;;  %v2641_v41 = vrot.slane %v2625_v55, %v5301_v53  ;;  %4860 = vmatpush1.bf16.msra.mxu1 %v5731_v31  ;;  %v6575_v36 = vld [vmem:[#allocation12_spill] sm:$0xff]  ;;  %v6578_v33 = vld [vmem:[#allocation2_spill] sm:$0xff] }
  0xed   : > { %v1052_v17 = vrot.slane %v1044_v1, %v5301_v53  ;;  %v2624_v7 = vcombine.low %v4698_v30, %v4699_v45  ;;  %v2648_v46 = vrot.slane %v2626_v27, %v5301_v53  ;;  %v4666_v13 = vcombine.high %v5691_v61, %v5703_v10  ;;  %4851 = vmatprep.subr.bf16.mxu1 %v6562_v38  ;;  %v6579_v1 = vld [vmem:[#allocation3_spill] sm:$0xff]  ;;  %v6580_v52 = vld [vmem:[#allocation10_spill] sm:$0xff] }
  0xee   : > { %v1059_v49 = vrot.slane %v1045_v11, %v5301_v53  ;;  %v2655_v40 = vrot.slane %v2627_v4, %v5301_v53  ;;  %v1078_v39 = vrot.slane %v5768_v57, %v5301_v53  ;;  %v1085_v48 = vrot.slane %v5774_v54, %v5301_v53  ;;  %4832 = vmatmul.mubr.bf16.gmra.mrb[8].mxu1 %v2623_v20  ;;  %v6582_v4 = vld [vmem:[#allocation6_spill] sm:$0xff] }
  0xef   : > { %v1092_v47 = vrot.slane %v5786_v18, %v5301_v53  ;;  %v2634_v0 = vrot.slane %v2624_v7, %v5301_v53  ;;  %v1071_v61 = vrot.slane %v4666_v13, %v5301_v53  ;;  %v2317_v10 = vcombine.high %v5771_v23, %v5771_v23  ;;  %4835 = vmatprep.mubr.msk.bf16.mxu1 %vm5035_vm3, %v6561_v32 }
  0xf0   : > { %v1060_v26 = vcombine.low %v1052_v17, %v1059_v49  ;;  %v2657_v31 = vcombine.low %v2648_v46, %v2655_v40  ;;  %v2318_v54 = vcombine.high %v5779_v28, %v5779_v28  ;;  %v2383_v18 = vunpack.i.h.s16 %v5771_v23  ;;  %4861 = vmatpush1.bf16.msra.mxu1 %v5766_v44  ;;  %v6583_v49 = vld [vmem:[#allocation7_spill] sm:$0xff]  ;;  %v6584_v46 = vld [vmem:[#allocation8_spill] sm:$0xff]  ;;  %v6585_v40 = vld [vmem:[#allocation9_spill] sm:$0xff] }
  0xf1   : > { %v1094_v57 = vcombine.low %v1085_v48, %v1092_v47  ;;  %v2656_v16 = vcombine.low %v2634_v0, %v2641_v41  ;;  %v1093_v8 = vcombine.low %v1071_v61, %v1078_v39  ;;  %v2385_v43 = vunpack.i.h.s16 %v5779_v28  ;;  %4852 = vmatprep.subr.bf16.mxu1 %v6562_v38  ;;  %v6586_v48 = vld [vmem:[#allocation14_spill] sm:$0xff]  ;;  %v6587_v47 = vld [vmem:[#allocation13_spill] sm:$0xff] }
  0xf2   : > { %4800 = vmatmul.mubr.msk.bf16.gmra.mrb[12].mxu0 %vm1196_vm7, %v1060_v26  ;;  %v2387_v12 = vunpack.i.h.s16 %v2317_v10  ;;  %v2309_v6 = vrot.slane %v5756_v63, %v5301_v53  ;;  %v2671_v37 = vrot.slane %v2657_v31, %v5301_v53  ;;  %v2389_v23 = vunpack.i.h.s16 %v2318_v54 }
  0xf3   : > { %4803 = vmatprep.mubr.msk.bf16.mxu0 %vm5035_vm3, %v6561_v32  ;;  %v1108_v56 = vrot.slane %v1094_v57, %v5301_v53  ;;  %v2664_v34 = vrot.slane %v2656_v16, %v5301_v53  ;;  %v1101_v19 = vrot.slane %v1093_v8, %v5301_v53  ;;  %v4702_v24 = vpack.i.b16 %v5779_v28, %v2383_v18  ;;  %v6576_v28 = vld [vmem:[#allocation4_spill] sm:$0xff]  ;;  %v6589_v57 = vld [vmem:[#allocation15_spill] sm:$0xff]  ;;  %v6591_v16 = vld [vmem:[#allocation17_spill] sm:$0xff] }
  0xf4   : > { %v4703_v44 = vpack.i.b16 %v2317_v10, %v2385_v43  ;;  %v4704_v15 = vpack.i.b16 %v2318_v54, %v2387_v12  ;;  %v4705_v62 = vpack.i.b16 %v2309_v6, %v2389_v23  ;;  %v4272_v63 = vrot.slane %v5232_v42, 4  ;;  %4862 = vmatpush1.bf16.msra.mxu1 %v5797_v14  ;;  %v6590_v54 = vld [vmem:[#allocation16_spill] sm:$0xff]  ;;  %v6592_v8 = vld [vmem:[#allocation18_spill] sm:$0xff]  ;;  %v6593_v12 = vld [vmem:[#allocation11_spill] sm:$0xff] }
  0xf5   : > { %v4274_v51 = vrot.slane %v5255_v58, 4  ;;  %v2672_v50 = vcombine.low %v2664_v34, %v2671_v37  ;;  %v1109_v35 = vcombine.low %v1101_v19, %v1108_v56  ;;  %v4275_v38 = vrot.slane %v5257_v59, 4 }
  0xf6   : > { %v2673_v25 = vcombine.low %v4702_v24, %v4703_v44  ;;  %v2674_v22 = vcombine.low %v4704_v15, %v4705_v62  ;;  %v4744_v9 = vpack.c.bf16 %v6575_v36, %v5312_v5  ;;  %v4259_v29 = vrot.slane %v6576_v28, 4 }
  0xf7   : > { %4836 = vmatmul.mubr.bf16.gmra.mrb[12].mxu1 %v2672_v50  ;;  %v4260_v60 = vrot.slane %v6577_v3, 4  ;;  %v4262_v42 = vrot.slane %v6578_v33, 4  ;;  %v4263_v58 = vrot.slane %v6579_v1, 4  ;;  %v6581_v5 = vrot.slane %v6580_v52, 4 }
  0xf8   : > { %4839 = vmatprep.mubr.msk.bf16.mxu1 %vm5035_vm3, %v6561_v32  ;;  %v2681_v14 = vrot.slane %v2673_v25, %v5301_v53  ;;  %v2688_v59 = vrot.slane %v2674_v22, %v5301_v53  ;;  %v4276_v11 = vsel %vm4252_vm6, %v4274_v51, %v4275_v38  ;;  %v4265_v41 = vrot.slane %v6582_v4, 4 }
  0xf9   : > { %v4273_v55 = vsel %vm4252_vm6, %v6581_v5, %v4272_v63  ;;  %v4261_v45 = vsel %vm4252_vm6, %v4259_v29, %v4260_v60  ;;  %v4264_v27 = vsel %vm4252_vm6, %v4262_v42, %v4263_v58  ;;  %v4266_v7 = vrot.slane %v6583_v49, 4 }
  0xfa   : > { %4804 = vmatmul.mubr.msk.bf16.gmra.mrb[16].mxu0 %vm1196_vm7, %v1109_v35  ;;  %v2689_v30 = vcombine.low %v2681_v14, %v2688_v59  ;;  %v4750_v32 = vpack.c.bf16 %v4276_v11, %v4273_v55  ;;  %v4746_v17 = vpack.c.bf16 %v4264_v27, %v4261_v45  ;;  %v4268_v13 = vrot.slane %v6584_v46, 4 }
  0xfb   : > { %4736 = vmatprep.mubr.msk.bf16.mxu0 %vm469_vm4, %v4744_v9  ;;  %v4269_v39 = vrot.slane %v6585_v40, 4  ;;  %v6588_v26 = vpack.c.bf16 %v6586_v48, %v6587_v47  ;;  %v4267_v0 = vsel %vm4252_vm6, %v4265_v41, %v4266_v7  ;;  %v4749_v10 = vpack.c.bf16 %v5724_v21, %v5661_v2  ;;  %v5957_v2 = vld [vmem:[%s6520_s4] sm:$0x7] }
  0xfc   : > { %v2696_v20 = vrot.slane %v2689_v30, %v5301_v53  ;;  %v4745_v18 = vpack.c.bf16 %v6590_v54, %v6589_v57  ;;  %v4747_v43 = vpack.c.bf16 %v6592_v8, %v6591_v16  ;;  %v525_v6 = vsub.s32 0, %v6593_v12 }
  0xfd   : > { %v4270_v61 = vsel %vm4252_vm6, %v4268_v13, %v4269_v39  ;;  %v5038_v37 = vmov 1983009808   ;;  %v1997_v34 = vsub.s32 1, %v6593_v12 }
  0xfe   : > { %v4748_v31 = vpack.c.bf16 %v4270_v61, %v4267_v0  ;;  %v850_v56 = vunpack.c.l.s4 %v5038_v37  ;;  %v526_v21 = vrot.slane %v5957_v2, %v525_v6 }
  0xff   : > { %4840 = vmatmul.mubr.bf16.gmra.mrb[16].mxu1 %v2696_v20  ;;  %v1998_v44 = vrot.slane %v5957_v2, %v1997_v34 }
 0x100   : > { %4739 = vmatprep.mubr.msk.bf16.mxu1 %vm469_vm4, %v4750_v32  ;;  %v851_v23 = vunpack.c.0.s8 %v850_v56  ;;  %v848_v19 = vcombine.high %v526_v21, %v526_v21 }
 0x101   : > { %v2392_v63 = vcombine.high %v1998_v44, %v1998_v44  ;;  %v2399_v35 = vrot.slane %v1998_v44, %v5301_v53 }
 0x102   : > { %4474 = vmatmul.mubr.bf16.vlgmr.msra.gmra.mrb[20].mxu0 %v6588_v26  ;;  %v5962_v24 = vsub.s32 %v851_v23, %v6593_v12 }
 0x103   : > { %4737 = vmatprep.mubr.msk.bf16.mxu0 %vm469_vm4, %v4746_v17  ;;  %v2406_v25 = vrot.slane %v2392_v63, %v5301_v53  ;;  %v2407_v36 = vcombine.high %v2399_v35, %v2399_v35  ;;  %v2415_v33 = vrot.slane %v2399_v35, %v5301_v53 }
 0x104   : > { %v5966_v15 = vrot.slane %v526_v21, %v5962_v24  ;;  %v862_v62 = vrot.slane %v848_v19, %v5962_v24 }
 0x105   : > { %v2408_v29 = vcombine.high %v2406_v25, %v2406_v25  ;;  %v2422_v42 = vrot.slane %v2406_v25, %v5301_v53  ;;  %v2429_v1 = vrot.slane %v2407_v36, %v5301_v53  ;;  %v2437_v5 = vcombine.high %v2415_v33, %v2415_v33 }
 0x106   : > { %v863_v51 = vcombine.high %v5966_v15, %v5966_v15  ;;  %v5971_v50 = vcombine.high %v862_v62, %v862_v62  ;;  %v1163_v9 = vcombine.low %v5966_v15, %v5966_v15  ;;  %v2799_v49 = vcombine.low %v2415_v33, %v2415_v33 }
 0x107   : > { %4498 = vmatmul.mubr.bf16.vlgmr.msra.gmra.mrb[20].mxu1 %v4749_v10  ;;  %v2436_v59 = vrot.slane %v2408_v29, %v5301_v53  ;;  %v2438_v55 = vcombine.high %v2422_v42, %v2422_v42  ;;  %v2439_v11 = vcombine.high %v2429_v1, %v2429_v1  ;;  %v2750_v27 = vcombine.low %v2415_v33, %v2429_v1 }
 0x108   : > { %v1146_v38 = vcombine.low %v5966_v15, %v863_v51  ;;  %v1147_v22 = vcombine.low %v862_v62, %v5971_v50  ;;  %v1164_v28 = vcombine.low %v863_v51, %v862_v62  ;;  %v5989_v58 = vrot.slane %v1163_v9, %v5962_v24 }
 0x109   : > { %v4716_v32 = vcombine.high %v2415_v33, %v2429_v1  ;;  %v2752_v20 = vcombine.low %v2422_v42, %v2436_v59  ;;  %v4717_v41 = vcombine.high %v2422_v42, %v2436_v59  ;;  %v2800_v46 = vcombine.low %v2429_v1, %v2437_v5 }
 0x10a   : > { %4482 = vmatmul.mubr.bf16.gmra.mrb[24].mxu0 %v4745_v18  ;;  %v5980_v3 = vrot.slane %v1146_v38, %v5962_v24  ;;  %v5983_v60 = vrot.slane %v1147_v22, %v5962_v24  ;;  %v5992_v14 = vrot.slane %v1164_v28, %v5962_v24  ;;  %v2801_v13 = vcombine.low %v2439_v11, %v2422_v42 }
 0x10b   : > { %4738 = vmatprep.mubr.msk.bf16.mxu0 %vm469_vm4, %v4748_v31  ;;  %v2802_v40 = vcombine.low %v2436_v59, %v2438_v55  ;;  %v2440_v0 = vcombine.high %v2436_v59, %v2436_v59  ;;  %v2760_v61 = vrot.slane %v2750_v27, %v5301_v53  ;;  %v2767_v10 = vrot.slane %v4716_v32, %v5301_v53 }
 0x10c   : > { %v5997_v52 = vcombine.low %v5980_v3, %v5983_v60  ;;  %v6001_v30 = vcombine.low %v5989_v58, %v5992_v14  ;;  %v2774_v31 = vrot.slane %v2752_v20, %v5301_v53  ;;  %v2781_v18 = vrot.slane %v4717_v41, %v5301_v53 }
 0x10d   : > { %v2809_v16 = vrot.slane %v2799_v49, %v5301_v53  ;;  %v2823_v6 = vrot.slane %v2801_v13, %v5301_v53  ;;  %v2830_v37 = vrot.slane %v2802_v40, %v5301_v53  ;;  %v2848_v34 = vcombine.low %v2440_v0, %v2415_v33 }
 0x10e   : > { %v2782_v44 = vcombine.low %v2760_v61, %v2767_v10  ;;  %v2783_v35 = vcombine.low %v2774_v31, %v2781_v18  ;;  %v1180_v5 = vcombine.low %v5971_v50, %v5966_v15 }
 0x10f   : > { %v2832_v38 = vcombine.low %v2823_v6, %v2830_v37  ;;  %v2855_v36 = vrot.slane %v2848_v34, %v5301_v53  ;;  %v2873_v27 = vcombine.low %v2781_v18, %v2809_v16  ;;  %v6072_v18 = vcombine.low %v5983_v60, %v5989_v58 }
 0x110   : > { %v6024_v33 = vrot.slane %v2782_v44, %v5301_v53  ;;  %v6027_v42 = vrot.slane %v2783_v35, %v5301_v53 }
 0x111   : > { %v6033_v59 = vrot.slane %v2832_v38, %v5301_v53  ;;  %v2856_v11 = vcombine.low %v2855_v36, %v2760_v61 }
 0x112   : > { %4490 = vmatmul.mubr.bf16.gmra.mrb[28].mxu0 %v4747_v43  ;;  %v2816_v43 = vrot.slane %v2800_v46, %v5301_v53  ;;  %v2798_v49 = vcombine.low %v6024_v33, %v6027_v42  ;;  %v1187_v46 = vrot.slane %v1180_v5, %v5962_v24 }
 0x113   : > { %v6045_v50 = vrot.slane %v2856_v11, %v5301_v53 }
 0x114   : > { %v2831_v25 = vcombine.low %v2809_v16, %v2816_v43 }
 0x116   : > { %v6030_v1 = vrot.slane %v2831_v25, %v5301_v53 }
 0x118   : > { %v2847_v15 = vcombine.low %v6030_v1, %v6033_v59 }
 0x18d   : > { %v1246_v45 = vpop.f32.mrb[0].mxu0 }
 0x18e   : > { %v1247_v17 = vadd.f32 %v1246_v45, %v5997_v52  ;;  %v4789_v4 = vpop.f32.mrb[1].mxu0  ;;  %v2857_v45 = vcombine.low %v2767_v10, %v2774_v31 }
 0x18f   : > { %v1249_v7 = vpop.f32.mrb[2].mxu0  ;;  %v2890_v4 = vcombine.low %v2830_v37, %v2855_v36 }
 0x190   : > { %v1295_v39 = vcombine.high %v1247_v17, %v1247_v17  ;;  %v1302_v48 = vrot.slane %v1247_v17, %v5962_v24  ;;  %v1250_v47 = vadd.f32 %v1249_v7, %v6001_v30  ;;  %v4790_v26 = vpop.f32.mrb[3].mxu0  ;;  %v2874_v17 = vcombine.low %v2816_v43, %v2823_v6 }
 0x191   : > { %v4323_v7 = vsub.s32 2, %v6593_v12  ;;  %v6048_v13 = vrot.slane %v2857_v45, %v5301_v53 }
 0x192   : > { %v1309_v57 = vrot.slane %v1295_v39, %v5962_v24  ;;  %v1310_v54 = vcombine.high %v1302_v48, %v1302_v48  ;;  %v6013_v8 = vrot.slane %v1250_v47, %v5962_v24  ;;  %v1505_v21 = vmax.f32 %v1302_v48, 0.0 }
 0x193   : > { %v1312_v32 = vcombine.high %v1250_v47, %v1250_v47  ;;  %v6054_v48 = vrot.slane %v2873_v27, %v5301_v53  ;;  %v6057_v12 = vrot.slane %v2874_v17, %v5301_v53  ;;  %v6060_v47 = vrot.slane %v2890_v4, %v5301_v53 }
 0x194   : > { %v1311_v56 = vcombine.high %v1309_v57, %v1309_v57  ;;  %v1506_v23 = vmax.f32 %v1310_v54, 0.0  ;;  %v1509_v19 = vmax.f32 %v6013_v8, 0.0  ;;  %v1507_v62 = vmax.f32 %v1309_v57, 0.0 }
 0x195   : > { %v6051_v40 = vrot.slane %v1312_v32, %v5962_v24  ;;  %v1327_v26 = vcombine.high %v6013_v8, %v6013_v8  ;;  %v6065_v10 = vrot.slane %v5957_v2, %v4323_v7  ;;  %v6068_v54 = vcombine.low %v1187_v46, %v5980_v3 }
 0x196   : > { %v1508_v63 = vmax.f32 %v1311_v56, 0.0  ;;  %v1585_v51 = vcombine.low %v1505_v21, %v1506_v23  ;;  %v1608_v9 = vrot.slane %v1509_v19, %v5962_v24  ;;  %v2872_v8 = vcombine.low %v6045_v50, %v6048_v13 }
 0x197   : > { %v1511_v2 = vmax.f32 %v6051_v40, 0.0  ;;  %v6079_v56 = vcombine.low %v5992_v14, %v1187_v46  ;;  %v2889_v3 = vcombine.low %v6054_v48, %v6057_v12  ;;  %v1510_v58 = vmax.f32 %v1327_v26, 0.0 }
 0x198   : > { %v1586_v22 = vcombine.low %v1507_v62, %v1508_v63  ;;  %v1593_v28 = vrot.slane %v1585_v51, %v5962_v24  ;;  %v1794_v20 = vsel %vm1793_vm8, %v1608_v9, -inf  ;;  %v1328_v9 = vcombine.high %v6051_v40, %v6051_v40 }
 0x199   : > { %v6099_v11 = vcombine.low %v1510_v58, %v1511_v2 }
 0x19a   : > { %v1600_v29 = vrot.slane %v1586_v22, %v5962_v24 }
 0x19c   : > { %v1601_v55 = vcombine.low %v1593_v28, %v1600_v29 }
 0x19e   : > { %v1795_v41 = vmax.f32 %v1601_v55, %v1794_v20 }
 0x1a0   : > { %v1796_v31 = vrot.slane %v1795_v41, 4 }
 0x1a2   : > { %v2946_v39 = vpop.f32.mrb[0].mxu1  ;;  %v1797_v44 = vmax.f32 %v1795_v41, %v1796_v31 }
 0x1a3   : > { %v2947_v0 = vadd.f32 %v2946_v39, %v2798_v49  ;;  %v4825_v61 = vpop.f32.mrb[1].mxu1 }
 0x1a4   : > { %v2949_v57 = vpop.f32.mrb[2].mxu1  ;;  %v1798_v20 = vrot.slane %v1797_v44, 2 }
 0x1a5   : > { %v2993_v16 = vcombine.high %v2947_v0, %v2947_v0  ;;  %v3000_v43 = vrot.slane %v2947_v0, %v5301_v53  ;;  %v2950_v6 = vadd.f32 %v2949_v57, %v2847_v15  ;;  %v4826_v37 = vpop.f32.mrb[3].mxu1 }
 0x1a7   : > { %v3007_v21 = vrot.slane %v2993_v16, %v5301_v53  ;;  %v3008_v23 = vcombine.high %v3000_v43, %v3000_v43  ;;  %v3016_v34 = vrot.slane %v3000_v43, %v5301_v53  ;;  %v1254_v19 = vpop.f32.mrb[4].mxu0  ;;  %v3042_v62 = vcombine.high %v2950_v6, %v2950_v6 }
 0x1a8   : > { %v3049_v63 = vrot.slane %v2950_v6, %v5301_v53  ;;  %v4793_v51 = vpop.f32.mrb[5].mxu0  ;;  %v6104_v43 = vmax.f32 %v1797_v44, %v1798_v20  ;;  %v1255_v37 = vadd.f32 %v1254_v19, %v6068_v54 }
 0x1a9   : > { %v3009_v35 = vcombine.high %v3007_v21, %v3007_v21  ;;  %v3023_v25 = vrot.slane %v3007_v21, %v5301_v53  ;;  %v3030_v38 = vrot.slane %v3008_v23, %v5301_v53  ;;  %v6092_v22 = vpop.f32.mrb[6].mxu0  ;;  %v3038_v28 = vcombine.high %v3016_v34, %v3016_v34 }
 0x1aa   : > { %v3056_v29 = vrot.slane %v3042_v62, %v5301_v53  ;;  %v3057_v5 = vcombine.high %v3049_v63, %v3049_v63  ;;  %v4794_v55 = vpop.f32.mrb[7].mxu0  ;;  %v3506_v17 = vmax.f32 %v3016_v34, 0.0  ;;  %v3065_v26 = vrot.slane %v3049_v63, %v5301_v53 }
 0x1ab   : > { %v3037_v45 = vrot.slane %v3009_v35, %v5301_v53  ;;  %v3039_v27 = vcombine.high %v3023_v25, %v3023_v25  ;;  %v3040_v32 = vcombine.high %v3030_v38, %v3030_v38  ;;  %v3507_v4 = vmax.f32 %v3030_v38, 0.0 }
 0x1ac   : > { %v3508_v41 = vmax.f32 %v3038_v28, 0.0  ;;  %v3510_v46 = vmax.f32 %v3023_v25, 0.0  ;;  %v3058_v39 = vcombine.high %v3056_v29, %v3056_v29  ;;  %v3079_v0 = vrot.slane %v3057_v5, %v5301_v53 }
 0x1ad   : > { %v3041_v49 = vcombine.high %v3037_v45, %v3037_v45  ;;  %v3509_v7 = vmax.f32 %v3040_v32, 0.0  ;;  %v3511_v15 = vmax.f32 %v3037_v45, 0.0  ;;  %v3650_v40 = vcombine.low %v3506_v17, %v3507_v4 }
 0x1ae   : > { %v3512_v61 = vmax.f32 %v3039_v27, 0.0  ;;  %v3072_v6 = vrot.slane %v3056_v29, %v5301_v53  ;;  %v3087_v34 = vcombine.high %v3065_v26, %v3065_v26  ;;  %v1512_v62 = vmax.f32 %v1328_v9, 0.0 }
 0x1af   : > { %v3513_v31 = vmax.f32 %v3041_v49, 0.0  ;;  %v3651_v57 = vcombine.low %v3508_v41, %v3509_v7  ;;  %v3652_v16 = vcombine.low %v3510_v46, %v3511_v15  ;;  %v3660_v21 = vrot.slane %v3650_v40, %v5301_v53 }
 0x1b0   : > { %v6113_v63 = vrot.slane %v3058_v39, %v5301_v53  ;;  %v3089_v51 = vcombine.high %v3079_v0, %v3079_v0  ;;  %v3514_v44 = vmax.f32 %v3065_v26, 0.0  ;;  %v1617_v35 = vrot.slane %v6099_v11, %v5962_v24 }
 0x1b1   : > { %v3653_v58 = vcombine.low %v3512_v61, %v3513_v31  ;;  %v3667_v23 = vrot.slane %v3651_v57, %v5301_v53  ;;  %v3674_v19 = vrot.slane %v3652_v16, %v5301_v53  ;;  %v1800_v28 = vrot.slane %v6104_v43, 1 }
 0x1b2   : > { %v3088_v29 = vcombine.high %v3072_v6, %v3072_v6  ;;  %v3705_v5 = vrot.slane %v3514_v44, %v5301_v53  ;;  %v1329_v55 = vcombine.high %v1255_v37, %v1255_v37  ;;  %v3515_v45 = vmax.f32 %v3079_v0, 0.0 }
 0x1b3   : > { %v3681_v25 = vrot.slane %v3653_v58, %v5301_v53  ;;  %v3682_v38 = vcombine.low %v3660_v21, %v3667_v23  ;;  %v3516_v27 = vmax.f32 %v3087_v34, 0.0  ;;  %v1336_v32 = vrot.slane %v1255_v37, %v5962_v24 }
 0x1b4   : > { %v3090_v20 = vcombine.high %v6113_v63, %v6113_v63  ;;  %v3517_v11 = vmax.f32 %v3089_v51, 0.0  ;;  %v3712_v17 = vrot.slane %v3705_v5, %v5301_v53  ;;  %v1343_v4 = vrot.slane %v1329_v55, %v5962_v24 }
 0x1b5   : > { %v3683_v9 = vcombine.low %v3674_v19, %v3681_v25  ;;  %v3690_v41 = vrot.slane %v3682_v38, %v5301_v53  ;;  %v1344_v7 = vcombine.high %v1336_v32, %v1336_v32  ;;  %v1513_v46 = vmax.f32 %v1336_v32, 0.0 }
 0x1b6   : > { %v3518_v15 = vmax.f32 %v3072_v6, 0.0  ;;  %v3519_v40 = vmax.f32 %v6113_v63, 0.0  ;;  %v3520_v39 = vmax.f32 %v3088_v29, 0.0  ;;  %v1345_v26 = vcombine.high %v1343_v4, %v1343_v4 }
 0x1b7   : > { %v3697_v49 = vrot.slane %v3683_v9, %v5301_v53  ;;  %v3713_v61 = vcombine.low %v3515_v45, %v3516_v27  ;;  %v1514_v31 = vmax.f32 %v1344_v7, 0.0  ;;  %v1610_v57 = vcombine.low %v1512_v62, %v1513_v46 }
 0x1b8   : > { %v4171_v37 = vsel %vm4170_vm9, %v3712_v17, -inf  ;;  %v1516_v58 = vmax.f32 %v1345_v26, 0.0  ;;  %v1258_v21 = vadd.f32 %v6092_v22, %v6072_v18  ;;  %v3714_v34 = vcombine.low %v3517_v11, %v3518_v15 }
 0x1b9   : > { %v3698_v0 = vcombine.low %v3690_v41, %v3697_v49  ;;  %v2954_v16 = vpop.f32.mrb[4].mxu1  ;;  %v1624_v44 = vrot.slane %v1610_v57, %v5962_v24  ;;  %v1632_v19 = vrot.slane %v1514_v31, %v5962_v24  ;;  %v1515_v38 = vmax.f32 %v1343_v4, 0.0 }
 0x1ba   : > { %v2955_v23 = vadd.f32 %v2954_v16, %v2872_v8  ;;  %v4829_v6 = vpop.f32.mrb[5].mxu1  ;;  %v1346_v29 = vcombine.high %v1258_v21, %v1258_v21  ;;  %v1353_v5 = vrot.slane %v1258_v21, %v5962_v24  ;;  %v6146_v17 = vcombine.low %v3519_v40, %v3520_v39 }
 0x1bb   : > { %v4172_v51 = vmax.f32 %v3698_v0, %v4171_v37  ;;  %v6137_v25 = vpop.f32.mrb[8].mxu0  ;;  %v6139_v62 = vpop.f32.mrb[6].mxu1  ;;  %v1625_v8 = vcombine.low %v1617_v35, %v1624_v44  ;;  %v1802_v27 = vsel %vm1793_vm8, %v1632_v19, -inf  ;;  %v1633_v41 = vcombine.low %v1515_v38, %v1516_v58 }
 0x1bc   : > { %v3091_v22 = vcombine.high %v2955_v23, %v2955_v23  ;;  %v4797_v55 = vpop.f32.mrb[9].mxu0  ;;  %v4830_v9 = vpop.f32.mrb[7].mxu1  ;;  %v3098_v32 = vrot.slane %v2955_v23, %v5301_v53  ;;  %v1360_v49 = vrot.slane %v1346_v29, %v5962_v24  ;;  %v1361_v4 = vcombine.high %v1353_v5, %v1353_v5 }
 0x1bd   : > { %v4173_v45 = vrot.slane %v4172_v51, 4  ;;  %v6144_v11 = vpop.f32.mrb[10].mxu0  ;;  %v1803_v46 = vmax.f32 %v1625_v8, %v1802_v27  ;;  %v1517_v15 = vmax.f32 %v1353_v5, 0.0  ;;  %v3723_v37 = vrot.slane %v3713_v61, %v5301_v53 }
 0x1be   : > { %v4798_v7 = vpop.f32.mrb[11].mxu0  ;;  %v3105_v26 = vrot.slane %v3091_v22, %v5301_v53  ;;  %v3106_v0 = vcombine.high %v3098_v32, %v3098_v32  ;;  %v1518_v35 = vmax.f32 %v1361_v4, 0.0  ;;  %v1519_v57 = vmax.f32 %v1360_v49, 0.0 }
 0x1bf   : > { %v4174_v31 = vmax.f32 %v4172_v51, %v4173_v45  ;;  %v3114_v16 = vrot.slane %v3098_v32, %v5301_v53  ;;  %v3730_v40 = vrot.slane %v3714_v34, %v5301_v53  ;;  %v1804_v39 = vrot.slane %v1803_v46, 4 }
 0x1c0   : > { %v3107_v58 = vcombine.high %v3105_v26, %v3105_v26  ;;  %v3737_v23 = vrot.slane %v6146_v17, %v5301_v53  ;;  %v1641_v6 = vrot.slane %v1633_v41, %v5962_v24  ;;  %v1634_v44 = vcombine.low %v1517_v15, %v1518_v35 }
 0x1c1   : > { %v6153_v21 = vpop.f32.mrb[8].mxu1  ;;  %v3128_v51 = vrot.slane %v3106_v0, %v5301_v53  ;;  %v1805_v38 = vmax.f32 %v1803_v46, %v1804_v39  ;;  %v1656_v29 = vrot.slane %v1519_v57, %v5962_v24  ;;  %v3121_v61 = vrot.slane %v3105_v26, %v5301_v53 }
 0x1c2   : > { %v4833_v19 = vpop.f32.mrb[9].mxu1  ;;  %v3135_v34 = vrot.slane %v3107_v58, %v5301_v53  ;;  %v4175_v55 = vrot.slane %v4174_v31, 2  ;;  %v1648_v9 = vrot.slane %v1634_v44, %v5962_v24  ;;  %v3136_v45 = vcombine.high %v3114_v16, %v3114_v16 }
 0x1c3   : > { %v6162_v5 = vpop.f32.mrb[10].mxu1  ;;  %v3138_v8 = vcombine.high %v3128_v51, %v3128_v51  ;;  %v3745_v17 = vcombine.low %v3723_v37, %v3730_v40  ;;  %v1806_v41 = vrot.slane %v1805_v38, 2  ;;  %v3522_v7 = vmax.f32 %v3114_v16, 0.0 }
 0x1c4   : > { %v4834_v27 = vpop.f32.mrb[11].mxu1  ;;  %v3139_v4 = vcombine.high %v3135_v34, %v3135_v34  ;;  %v1649_v15 = vcombine.low %v1641_v6, %v1648_v9  ;;  %v3521_v26 = vmax.f32 %v3090_v20, 0.0  ;;  %v3523_v0 = vmax.f32 %v3128_v51, 0.0 }
 0x1c5   : > { %v6164_v22 = vpop.f32.mrb[12].mxu0  ;;  %v3525_v35 = vmax.f32 %v3138_v8, 0.0  ;;  %v1362_v39 = vcombine.high %v1360_v49, %v1360_v49  ;;  %v1810_v58 = vsel %vm1793_vm8, %v1656_v29, -inf  ;;  %v3137_v44 = vcombine.high %v3121_v61, %v3121_v61 }
 0x1c6   : > { %v4801_v32 = vpop.f32.mrb[13].mxu0  ;;  %v3527_v19 = vmax.f32 %v3135_v34, 0.0  ;;  %v6173_v27 = vmax.f32 %v4174_v31, %v4175_v55  ;;  %v1811_v37 = vmax.f32 %v1649_v15, %v1810_v58  ;;  %v3524_v40 = vmax.f32 %v3136_v45, 0.0 }
 0x1c7   : > { %v6167_v46 = vpop.f32.mrb[14].mxu0  ;;  %v3716_v16 = vcombine.low %v3521_v26, %v3522_v7  ;;  %v6175_v32 = vmax.f32 %v1805_v38, %v1806_v41  ;;  %v3526_v6 = vmax.f32 %v3121_v61, 0.0  ;;  %v3529_v9 = vmax.f32 %v3139_v4, 0.0 }
 0x1c8   : > { %v4802_v57 = vpop.f32.mrb[15].mxu0  ;;  %v3768_v63 = vrot.slane %v3523_v0, %v5301_v53  ;;  %v1812_v51 = vrot.slane %v1811_v37, 4  ;;  %v3776_v8 = vcombine.low %v3524_v40, %v3525_v35  ;;  %v1263_v29 = vadd.f32 %v6137_v25, %v6079_v56 }
 0x1c9   : > { %v3744_v49 = vrot.slane %v3716_v16, %v5301_v53  ;;  %v3753_v34 = vrot.slane %v3745_v17, %v5301_v53  ;;  %v1520_v55 = vmax.f32 %v1362_v39, 0.0  ;;  %v3528_v45 = vmax.f32 %v3137_v44, 0.0 }
 0x1ca   : > { %v6178_v20 = vpop.f32.mrb[12].mxu1  ;;  %v6184_v38 = vcombine.low %v3526_v6, %v3527_v19  ;;  %v3775_v15 = vrot.slane %v3768_v63, %v5301_v53  ;;  %v1363_v26 = vcombine.high %v1263_v29, %v1263_v29  ;;  %v1370_v17 = vrot.slane %v1263_v29, %v5962_v24 }
 0x1cb   : > { %v4837_v31 = vpop.f32.mrb[13].mxu1  ;;  %v3746_v7 = vcombine.low %v3737_v23, %v3744_v49  ;;  %v3778_v57 = vcombine.low %v3528_v45, %v3529_v9  ;;  %v2958_v39 = vadd.f32 %v6139_v62, %v2889_v3  ;;  %v1813_v44 = vmax.f32 %v1811_v37, %v1812_v51 }
 0x1cc   : > { %v6188_v41 = vpop.f32.mrb[14].mxu1  ;;  %v3786_v19 = vrot.slane %v3776_v8, %v5301_v53  ;;  %v1377_v40 = vrot.slane %v1363_v26, %v5962_v24  ;;  %v3793_v6 = vrot.slane %v6184_v38, %v5301_v53  ;;  %v1378_v9 = vcombine.high %v1370_v17, %v1370_v17 }
 0x1cd   : > { %v6186_v61 = vpop.f32.mrb[16].mxu0  ;;  %v4838_v35 = vpop.f32.mrb[15].mxu1  ;;  %v3760_v23 = vrot.slane %v3746_v7, %v5301_v53  ;;  %v1521_v63 = vmax.f32 %v1370_v17, 0.0  ;;  %v3140_v49 = vcombine.high %v2958_v39, %v2958_v39  ;;  %v4179_v31 = vsel %vm4170_vm9, %v3775_v15, -inf }
 0x1ce   : > { %v4805_v0 = vpop.f32.mrb[17].mxu0  ;;  %v1379_v3 = vcombine.high %v1377_v40, %v1377_v40  ;;  %v1523_v62 = vmax.f32 %v1377_v40, 0.0  ;;  %v1522_v45 = vmax.f32 %v1378_v9, 0.0  ;;  %v3147_v51 = vrot.slane %v2958_v39, %v5301_v53 }
 0x1cf   : > { %v6198_v58 = vpop.f32.mrb[18].mxu0  ;;  %v3761_v29 = vcombine.low %v3753_v34, %v3760_v23  ;;  %v1657_v37 = vcombine.low %v1520_v55, %v1521_v63  ;;  %v3154_v8 = vrot.slane %v3140_v49, %v5301_v53  ;;  %v1814_v26 = vrot.slane %v1813_v44, 2 }
 0x1d0   : > { %v4806_v16 = vpop.f32.mrb[19].mxu0  ;;  %v1524_v35 = vmax.f32 %v1379_v3, 0.0  ;;  %v1266_v38 = vadd.f32 %v6144_v11, %v5997_v52  ;;  %v3800_v34 = vrot.slane %v3778_v57, %v5301_v53  ;;  %v1658_v15 = vcombine.low %v1522_v45, %v1523_v62 }
 0x1d1   : > { %v4180_v0 = vmax.f32 %v3761_v29, %v4179_v31  ;;  %v3155_v23 = vcombine.high %v3147_v51, %v3147_v51  ;;  %v3156_v40 = vcombine.high %v3154_v8, %v3154_v8  ;;  %v1665_v9 = vrot.slane %v1657_v37, %v5962_v24 }
 0x1d2   : > { %v6208_v7 = vpop.f32.mrb[16].mxu1  ;;  %v1680_v63 = vrot.slane %v1524_v35, %v5962_v24  ;;  %v3163_v49 = vrot.slane %v3147_v51, %v5301_v53  ;;  %v1672_v52 = vrot.slane %v1658_v15, %v5962_v24  ;;  %v3170_v11 = vrot.slane %v3154_v8, %v5301_v53 }
 0x1d3   : > { %v4841_v17 = vpop.f32.mrb[17].mxu1  ;;  %v4181_v39 = vrot.slane %v4180_v0, 4  ;;  %v3177_v57 = vrot.slane %v3155_v23, %v5301_v53  ;;  %v6222_v3 = vrot.slane %v3156_v40, %v5301_v53  ;;  %v1815_v45 = vmax.f32 %v1813_v44, %v1814_v26 }
 0x1d4   : > { %v2981_v55 = vpop.f32.mrb[18].mxu1  ;;  %v1818_v37 = vsel %vm1793_vm8, %v1680_v63, -inf  ;;  %v3185_v17 = vcombine.high %v3163_v49, %v3163_v49  ;;  %v1380_v35 = vcombine.high %v1266_v38, %v1266_v38  ;;  %v3808_v15 = vcombine.low %v3786_v19, %v3793_v6 }
 0x1d5   : > { %v6213_v16 = vpop.f32.mrb[20].mxu0  ;;  %v4842_v31 = vpop.f32.mrb[19].mxu1  ;;  %v4182_v51 = vmax.f32 %v4180_v0, %v4181_v39  ;;  %v3187_v2 = vcombine.high %v3177_v57, %v3177_v57  ;;  %v3530_v36 = vmax.f32 %v3163_v49, 0.0  ;;  %v3531_v8 = vmax.f32 %v3177_v57, 0.0 }
 0x1d6   : > { %v4477_v29 = vpop.f32.mrb[21].mxu0  ;;  %v3186_v31 = vcombine.high %v3170_v11, %v3170_v11  ;;  %v3532_v14 = vmax.f32 %v3185_v17, 0.0  ;;  %v3535_v40 = vmax.f32 %v6222_v3, 0.0  ;;  %v3534_v44 = vmax.f32 %v3170_v11, 0.0 }
 0x1d7   : > { %v6224_v62 = vpop.f32.mrb[22].mxu0  ;;  %v1673_v29 = vcombine.low %v1665_v9, %v1672_v52  ;;  %v3533_v60 = vmax.f32 %v3187_v2, 0.0  ;;  %v3779_v26 = vcombine.low %v3530_v36, %v3531_v8  ;;  %v1387_v0 = vrot.slane %v1266_v38, %v5962_v24 }
 0x1d8   : > { %v4480_v55 = vpop.f32.mrb[23].mxu0  ;;  %v3536_v25 = vmax.f32 %v3186_v31, 0.0  ;;  %v3831_v63 = vrot.slane %v3532_v14, %v5301_v53  ;;  %v1816_v9 = vrot.slane %v1815_v45, 1  ;;  %v4183_v52 = vrot.slane %v4182_v51, 2 }
 0x1d9   : > { %v1819_v23 = vmax.f32 %v1673_v29, %v1818_v37  ;;  %v1394_v6 = vrot.slane %v1380_v35, %v5962_v24  ;;  %v3807_v57 = vrot.slane %v3779_v26, %v5301_v53  ;;  %v3839_v37 = vcombine.low %v3533_v60, %v3534_v44 }
 0x1da   : > { %v6228_v4 = vpop.f32.mrb[20].mxu1  ;;  %v3840_v17 = vcombine.low %v3535_v40, %v3536_v25  ;;  %v6243_v38 = vmax.f32 %v6104_v43, %v1800_v28  ;;  %v3838_v35 = vrot.slane %v3831_v63, %v5301_v53  ;;  %v1395_v55 = vcombine.high %v1387_v0, %v1387_v0 }
 0x1db   : > { %v4501_v39 = vpop.f32.mrb[21].mxu1  ;;  %v1820_v19 = vrot.slane %v1819_v23, 4  ;;  %v1396_v29 = vcombine.high %v1394_v6, %v1394_v6  ;;  %v6595_v8 = vrot.slane %v6173_v27, 1  ;;  %v6596_v25 = vrot.slane %v6175_v32, 1 }
 0x1dc   : > { %v6235_v2 = vpop.f32.mrb[22].mxu1  ;;  %v3816_v44 = vrot.slane %v3808_v15, %v5301_v53  ;;  %v3809_v43 = vcombine.low %v3800_v34, %v3807_v57  ;;  %v6259_v26 = vmax.f32 %v1815_v45, %v1816_v9  ;;  %v6261_v63 = vmax.f32 %v4182_v51, %v4183_v52 }
 0x1dd   : > { %v6233_v49 = vpop.f32.mrb[24].mxu0  ;;  %v4504_v11 = vpop.f32.mrb[23].mxu1  ;;  %v6251_v60 = vmax.f32 %v6173_v27, %v6595_v8  ;;  %v6256_v40 = vmax.f32 %v6175_v32, %v6596_v25  ;;  %v1821_v39 = vmax.f32 %v1819_v23, %v1820_v19  ;;  %v3856_v8 = vrot.slane %v3840_v17, %v5301_v53 }
 0x1de   : > { %v4485_v14 = vpop.f32.mrb[25].mxu0  ;;  %v3823_v27 = vrot.slane %v3809_v43, %v5301_v53  ;;  %v3849_v11 = vrot.slane %v3839_v37, %v5301_v53  ;;  %v6597_v32 = vcombine.low %v6060_v47, %v6024_v33  ;;  %v4187_v45 = vsel %vm4170_vm9, %v3838_v35, -inf }
 0x1df   : > { %v6246_v31 = vpop.f32.mrb[26].mxu0  ;;  %v3188_v14 = vcombine.high %v6222_v3, %v6222_v3  ;;  %v1526_v15 = vmax.f32 %v1395_v55, 0.0  ;;  %v1528_v51 = vmax.f32 %v1396_v29, 0.0  ;;  %v6598_v23 = vcombine.low %v6027_v42, %v6030_v1 }
 0x1e0   : > { %6594 = vst [vmem:[#allocation12_spill] sm:$0xff] %v6246_v31  ;;  %v4488_v28 = vpop.f32.mrb[27].mxu0  ;;  %v2963_v34 = vadd.f32 %v6153_v21, %v6597_v32  ;;  %v3824_v9 = vcombine.low %v3816_v44, %v3823_v27  ;;  %v1525_v52 = vmax.f32 %v1387_v0, 0.0  ;;  %v1822_v37 = vrot.slane %v1821_v39, 2 }
 0x1e1   : > { %v2966_v3 = vadd.f32 %v6162_v5, %v6598_v23  ;;  %v1527_v17 = vmax.f32 %v1394_v6, 0.0  ;;  %v3871_v5 = vcombine.low %v3849_v11, %v3856_v8  ;;  %v3537_v43 = vmax.f32 %v3188_v14, 0.0 }
 0x1e2   : > { %v3189_v19 = vcombine.high %v2963_v34, %v2963_v34  ;;  %v3196_v57 = vrot.slane %v2963_v34, %v5301_v53  ;;  %v4188_v35 = vmax.f32 %v3824_v9, %v4187_v45  ;;  %v1681_v44 = vcombine.low %v1525_v52, %v1526_v15 }
 0x1e3   : > { %v3238_v25 = vcombine.high %v2966_v3, %v2966_v3  ;;  %v3245_v33 = vrot.slane %v2966_v3, %v5301_v53  ;;  %v1682_v0 = vcombine.low %v1527_v17, %v1528_v51 }
 0x1e4   : > { %v3203_v55 = vrot.slane %v3189_v19, %v5301_v53  ;;  %v3204_v29 = vcombine.high %v3196_v57, %v3196_v57  ;;  %v3212_v42 = vrot.slane %v3196_v57, %v5301_v53  ;;  %v4189_v27 = vrot.slane %v4188_v35, 4 }
 0x1e5   : > { %v6279_v21 = vpop.f32.mrb[28].mxu0  ;;  %v3252_v9 = vrot.slane %v3238_v25, %v5301_v53  ;;  %v3253_v19 = vcombine.high %v3245_v33, %v3245_v33  ;;  %v3261_v14 = vrot.slane %v3245_v33, %v5301_v53  ;;  %v1689_v25 = vrot.slane %v1681_v44, %v5962_v24 }
 0x1e6   : > { %6599 = vst [vmem:[#allocation4_spill] sm:$0xff] %v6279_v21  ;;  %v4493_v1 = vpop.f32.mrb[29].mxu0  ;;  %v3205_v6 = vcombine.high %v3203_v55, %v3203_v55  ;;  %v3219_v32 = vrot.slane %v3203_v55, %v5301_v53  ;;  %v3226_v34 = vrot.slane %v3204_v29, %v5301_v53  ;;  %v3234_v45 = vcombine.high %v3212_v42, %v3212_v42 }
 0x1e7   : > { %v6283_v28 = vpop.f32.mrb[30].mxu0  ;;  %v3538_v3 = vmax.f32 %v3212_v42, 0.0  ;;  %v4190_v15 = vmax.f32 %v4188_v35, %v4189_v27  ;;  %v3879_v42 = vrot.slane %v3871_v5, %v5301_v53  ;;  %v3275_v27 = vrot.slane %v3253_v19, %v5301_v53 }
 0x1e8   : > { %6600 = vst [vmem:[#allocation5_spill] sm:$0xff] %v6283_v28  ;;  %v4496_v23 = vpop.f32.mrb[31].mxu0  ;;  %v3233_v57 = vrot.slane %v3205_v6, %v5301_v53  ;;  %v3235_v11 = vcombine.high %v3219_v32, %v3219_v32  ;;  %v3236_v8 = vcombine.high %v3226_v34, %v3226_v34  ;;  %v3539_v51 = vmax.f32 %v3226_v34, 0.0 }
 0x1e9   : > { %v3540_v52 = vmax.f32 %v3234_v45, 0.0  ;;  %v3841_v17 = vcombine.low %v3537_v43, %v3538_v3  ;;  %v3542_v36 = vmax.f32 %v3219_v32, 0.0  ;;  %v6290_v23 = vmax.f32 %v1821_v39, %v1822_v37 }
 0x1ea   : > { %v3237_v1 = vcombine.high %v3233_v57, %v3233_v57  ;;  %v3541_v55 = vmax.f32 %v3236_v8, 0.0  ;;  %v3543_v29 = vmax.f32 %v3233_v57, 0.0  ;;  %v3544_v6 = vmax.f32 %v3235_v11, 0.0 }
 0x1eb   : > { %v3842_v28 = vcombine.low %v3539_v51, %v3540_v52  ;;  %v3863_v35 = vrot.slane %v3841_v17, %v5301_v53  ;;  %v3283_v32 = vcombine.high %v3261_v14, %v3261_v14  ;;  %v4191_v34 = vrot.slane %v4190_v15, 2 }
 0x1ec   : > { %v3545_v21 = vmax.f32 %v3237_v1, 0.0  ;;  %v3894_v31 = vrot.slane %v3541_v55, %v5301_v53  ;;  %v3902_v33 = vcombine.low %v3542_v36, %v3543_v29  ;;  %v1696_v39 = vrot.slane %v1682_v0, %v5962_v24 }
 0x1ed   : > { %v3870_v43 = vrot.slane %v3842_v28, %v5301_v53  ;;  %v3268_v5 = vrot.slane %v3252_v9, %v5301_v53  ;;  %v1824_v44 = vrot.slane %v6290_v23, 1  ;;  %v3254_v3 = vcombine.high %v3252_v9, %v3252_v9 }
 0x1ee   : > { %v3903_v37 = vcombine.low %v3544_v6, %v3545_v21  ;;  %v3285_v57 = vcombine.high %v3275_v27, %v3275_v27  ;;  %v3901_v36 = vrot.slane %v3894_v31, %v5301_v53  ;;  %v3912_v11 = vrot.slane %v3902_v33, %v5301_v53 }
 0x1ef   : > { %v3872_v45 = vcombine.low %v3863_v35, %v3870_v43  ;;  %v3546_v8 = vmax.f32 %v3261_v14, 0.0  ;;  %v3547_v51 = vmax.f32 %v3275_v27, 0.0  ;;  %v3548_v52 = vmax.f32 %v3283_v32, 0.0 }
 0x1f0   : > { %v3919_v28 = vrot.slane %v3903_v37, %v5301_v53  ;;  %v3549_v0 = vmax.f32 %v3285_v57, 0.0  ;;  %v4192_v21 = vmax.f32 %v4190_v15, %v4191_v34  ;;  %v1697_v17 = vcombine.low %v1689_v25, %v1696_v39 }
 0x1f1   : > { %v3886_v19 = vrot.slane %v3872_v45, %v5301_v53  ;;  %v3550_v55 = vmax.f32 %v3268_v5, 0.0  ;;  %v3904_v6 = vcombine.low %v3546_v8, %v3547_v51  ;;  %v1271_v31 = vadd.f32 %v6164_v22, %v6001_v30 }
 0x1f2   : > { %v3934_v1 = vcombine.low %v3912_v11, %v3919_v28  ;;  %v3905_v9 = vcombine.low %v3548_v52, %v3549_v0  ;;  %v4195_v33 = vsel %vm4170_vm9, %v3901_v36, -inf  ;;  %v6309_v35 = vrot.slane %v3254_v3, %v5301_v53 }
 0x1f3   : > { %v3887_v29 = vcombine.low %v3879_v42, %v3886_v19  ;;  %v3957_v14 = vrot.slane %v3550_v55, %v5301_v53  ;;  %v1274_v43 = vadd.f32 %v6167_v46, %v6068_v54  ;;  %v3926_v25 = vrot.slane %v3904_v6, %v5301_v53 }
 0x1f4   : > { %v3933_v42 = vrot.slane %v3905_v9, %v5301_v53  ;;  %v1397_v27 = vcombine.high %v1271_v31, %v1271_v31  ;;  %v3942_v32 = vrot.slane %v3934_v1, %v5301_v53  ;;  %v3284_v34 = vcombine.high %v3268_v5, %v3268_v5 }
 0x1f5   : > { %v4196_v15 = vmax.f32 %v3887_v29, %v4195_v33  ;;  %v1404_v30 = vrot.slane %v1271_v31, %v5962_v24  ;;  %v1414_v22 = vcombine.high %v1274_v43, %v1274_v43  ;;  %v3964_v37 = vrot.slane %v3957_v14, %v5301_v53 }
 0x1f6   : > { %v3935_v39 = vcombine.low %v3926_v25, %v3933_v42  ;;  %v1411_v45 = vrot.slane %v1397_v27, %v5962_v24  ;;  %v1421_v3 = vrot.slane %v1274_v43, %v5962_v24  ;;  %v4193_v54 = vrot.slane %v4192_v21, 1 }
 0x1f7   : > { %v4197_v46 = vrot.slane %v4196_v15, 4  ;;  %v1412_v57 = vcombine.high %v1404_v30, %v1404_v30  ;;  %v1529_v36 = vmax.f32 %v1404_v30, 0.0  ;;  %v1428_v5 = vrot.slane %v1414_v22, %v5962_v24 }
 0x1f8   : > { %v3949_v11 = vrot.slane %v3935_v39, %v5301_v53  ;;  %v1413_v28 = vcombine.high %v1411_v45, %v1411_v45  ;;  %v1531_v8 = vmax.f32 %v1411_v45, 0.0  ;;  %v3551_v19 = vmax.f32 %v6309_v35, 0.0 }
 0x1f9   : > { %v1530_v51 = vmax.f32 %v1412_v57, 0.0  ;;  %v1704_v52 = vrot.slane %v1529_v36, %v5962_v24  ;;  %v1429_v0 = vcombine.high %v1421_v3, %v1421_v3  ;;  %v3552_v1 = vmax.f32 %v3284_v34, 0.0 }
 0x1fa   : > { %v3950_v55 = vcombine.low %v3942_v32, %v3949_v11  ;;  %v4203_v29 = vsel %vm4170_vm9, %v3964_v37, -inf  ;;  %v1532_v6 = vmax.f32 %v1413_v28, 0.0  ;;  %v1533_v33 = vmax.f32 %v1421_v3, 0.0 }
 0x1fb   : > { %v1705_v9 = vcombine.low %v1530_v51, %v1531_v8  ;;  %v1826_v31 = vsel %vm1793_vm8, %v1704_v52, -inf  ;;  %v1534_v14 = vmax.f32 %v1429_v0, 0.0  ;;  %v4198_v43 = vmax.f32 %v4196_v15, %v4197_v46 }
 0x1fc   : > { %v4204_v25 = vmax.f32 %v3950_v55, %v4203_v29  ;;  %v1827_v42 = vmax.f32 %v1697_v17, %v1826_v31  ;;  %v1430_v27 = vcombine.high %v1428_v5, %v1428_v5  ;;  %v4185_v30 = vrot.slane %v6261_v63, 1 }
 0x1fd   : > { %v6329_v22 = vmax.f32 %v6290_v23, %v1824_v44  ;;  %v1706_v39 = vcombine.low %v1532_v6, %v1533_v33  ;;  %v6601_v32 = vcombine.low %v6033_v59, %v6045_v50  ;;  %v3286_v37 = vcombine.high %v6309_v35, %v6309_v35 }
 0x1fe   : > { %v3965_v45 = vcombine.low %v3551_v19, %v3552_v1  ;;  %v1828_v3 = vrot.slane %v1827_v42, 4  ;;  %v1728_v15 = vrot.slane %v1534_v14, %v5962_v24  ;;  %v1713_v17 = vrot.slane %v1705_v9, %v5962_v24 }
 0x1ff   : > { %v2971_v34 = vadd.f32 %v6178_v20, %v6601_v32  ;;  %v1720_v46 = vrot.slane %v1706_v39, %v5962_v24  ;;  %v6341_v44 = vmax.f32 %v4192_v21, %v4193_v54  ;;  %v4199_v36 = vrot.slane %v4198_v43, 2 }
 0x200   : > { %v4205_v59 = vrot.slane %v4204_v25, 4  ;;  %v1536_v50 = vmax.f32 %v1430_v27, 0.0  ;;  %v3975_v8 = vrot.slane %v3965_v45, %v5301_v53  ;;  %v1829_v19 = vmax.f32 %v1827_v42, %v1828_v3 }
 0x201   : > { %v3287_v57 = vcombine.high %v2971_v34, %v2971_v34  ;;  %v3294_v23 = vrot.slane %v2971_v34, %v5301_v53  ;;  %v1721_v20 = vcombine.low %v1713_v17, %v1720_v46  ;;  %v1535_v51 = vmax.f32 %v1428_v5, 0.0 }
 0x202   : > { %v1834_v52 = vsel %vm1793_vm8, %v1728_v15, -inf  ;;  %v6349_v55 = vmax.f32 %v4198_v43, %v4199_v36  ;;  %v4206_v29 = vmax.f32 %v4204_v25, %v4205_v59  ;;  %v3553_v27 = vmax.f32 %v3286_v37, 0.0 }
 0x203   : > { %v3301_v11 = vrot.slane %v3287_v57, %v5301_v53  ;;  %v3302_v35 = vcombine.high %v3294_v23, %v3294_v23  ;;  %v3310_v28 = vrot.slane %v3294_v23, %v5301_v53  ;;  %v1835_v0 = vmax.f32 %v1721_v20, %v1834_v52 }
 0x204   : > { %v1729_v31 = vcombine.low %v1535_v51, %v1536_v50  ;;  %v1830_v42 = vrot.slane %v1829_v19, 2  ;;  %v1279_v32 = vadd.f32 %v6186_v61, %v6072_v18  ;;  %v4207_v43 = vrot.slane %v4206_v29, 2 }
 0x205   : > { %v3303_v1 = vcombine.high %v3301_v11, %v3301_v11  ;;  %v3317_v21 = vrot.slane %v3301_v11, %v5301_v53  ;;  %v3324_v54 = vrot.slane %v3302_v35, %v5301_v53  ;;  %v3332_v6 = vcombine.high %v3310_v28, %v3310_v28 }
 0x206   : > { %v3554_v9 = vmax.f32 %v3310_v28, 0.0  ;;  %v1836_v34 = vrot.slane %v1835_v0, 4  ;;  %v6602_v37 = vcombine.low %v6048_v13, %v6054_v48  ;;  %v1431_v61 = vcombine.high %v1279_v32, %v1279_v32 }
 0x207   : > { %v3331_v33 = vrot.slane %v3303_v1, %v5301_v53  ;;  %v3334_v14 = vcombine.high %v3324_v54, %v3324_v54  ;;  %v3555_v5 = vmax.f32 %v3324_v54, 0.0  ;;  %v3556_v39 = vmax.f32 %v3332_v6, 0.0 }
 0x208   : > { %v3558_v15 = vmax.f32 %v3317_v21, 0.0  ;;  %v3333_v17 = vcombine.high %v3317_v21, %v3317_v21  ;;  %v3966_v46 = vcombine.low %v3553_v27, %v3554_v9  ;;  %v2974_v59 = vadd.f32 %v6188_v41, %v6602_v37 }
 0x209   : > { %v3335_v45 = vcombine.high %v3331_v33, %v3331_v33  ;;  %v3557_v3 = vmax.f32 %v3334_v14, 0.0  ;;  %v3559_v25 = vmax.f32 %v3331_v33, 0.0  ;;  %v3967_v23 = vcombine.low %v3555_v5, %v3556_v39 }
 0x20a   : > { %v3982_v50 = vrot.slane %v3966_v46, %v5301_v53  ;;  %v1438_v20 = vrot.slane %v1279_v32, %v5962_v24  ;;  %v6361_v11 = vmax.f32 %v1829_v19, %v1830_v42  ;;  %v1837_v35 = vmax.f32 %v1835_v0, %v1836_v34 }
 0x20b   : > { %v3561_v57 = vmax.f32 %v3335_v45, 0.0  ;;  %v3968_v36 = vcombine.low %v3557_v3, %v3558_v15  ;;  %v4020_v18 = vrot.slane %v3559_v25, %v5301_v53  ;;  %v3989_v28 = vrot.slane %v3967_v23, %v5301_v53 }
 0x20c   : > { %v3560_v52 = vmax.f32 %v3333_v17, 0.0  ;;  %v3997_v1 = vcombine.low %v3975_v8, %v3982_v50  ;;  %v1445_v13 = vrot.slane %v1431_v61, %v5962_v24  ;;  %v1446_v48 = vcombine.high %v1438_v20, %v1438_v20 }
 0x20d   : > { %v3996_v51 = vrot.slane %v3968_v36, %v5301_v53  ;;  %v4201_v41 = vrot.slane %v6349_v55, 1  ;;  %v6367_v21 = vmax.f32 %v4206_v29, %v4207_v43  ;;  %v1737_v54 = vrot.slane %v1729_v31, %v5962_v24 }
 0x20e   : > { %v4027_v19 = vrot.slane %v4020_v18, %v5301_v53  ;;  %v4028_v9 = vcombine.low %v3560_v52, %v3561_v57  ;;  %v1537_v0 = vmax.f32 %v1438_v20, 0.0  ;;  %v1538_v33 = vmax.f32 %v1446_v48, 0.0 }
 0x20f   : > { %v3998_v6 = vcombine.low %v3989_v28, %v3996_v51  ;;  %v4005_v14 = vrot.slane %v3997_v1, %v5301_v53  ;;  %v1539_v8 = vmax.f32 %v1445_v13, 0.0  ;;  %v3336_v42 = vcombine.high %v2974_v59, %v2974_v59 }
 0x210   : > { %v1832_v5 = vrot.slane %v6361_v11, 1  ;;  %v1838_v39 = vrot.slane %v1837_v35, 2  ;;  %v1730_v32 = vcombine.low %v1537_v0, %v1538_v33  ;;  %v3343_v29 = vrot.slane %v2974_v59, %v5301_v53 }
 0x211   : > { %v4012_v27 = vrot.slane %v3998_v6, %v5301_v53  ;;  %v1752_v31 = vrot.slane %v1539_v8, %v5962_v24  ;;  %v3350_v45 = vrot.slane %v3336_v42, %v5301_v53  ;;  %v1282_v3 = vadd.f32 %v6198_v58, %v6079_v56 }
 0x212   : > { %v4211_v15 = vsel %vm4170_vm9, %v4027_v19, -inf  ;;  %v1744_v43 = vrot.slane %v1730_v32, %v5962_v24  ;;  %v3351_v17 = vcombine.high %v3343_v29, %v3343_v29  ;;  %v3359_v25 = vrot.slane %v3343_v29, %v5301_v53 }
 0x213   : > { %v4013_v34 = vcombine.low %v4005_v14, %v4012_v27  ;;  %v4038_v46 = vrot.slane %v4028_v9, %v5301_v53  ;;  %v3352_v23 = vcombine.high %v3350_v45, %v3350_v45  ;;  %v3366_v36 = vrot.slane %v3350_v45, %v5301_v53 }
 0x214   : > { %v1447_v37 = vcombine.high %v1445_v13, %v1445_v13  ;;  %v1745_v59 = vcombine.low %v1737_v54, %v1744_v43  ;;  %v3373_v50 = vrot.slane %v3351_v17, %v5301_v53  ;;  %v3381_v18 = vcombine.high %v3359_v25, %v3359_v25 }
 0x215   : > { %v6383_v57 = vmax.f32 %v4013_v34, %v4211_v15  ;;  %v1842_v56 = vsel %vm1793_vm8, %v1752_v31, -inf  ;;  %v3380_v58 = vrot.slane %v3352_v23, %v5301_v53  ;;  %v3382_v61 = vcombine.high %v3366_v36, %v3366_v36 }
 0x216   : > { %v1448_v20 = vcombine.high %v1282_v3, %v1282_v3  ;;  %v1843_v28 = vmax.f32 %v1745_v59, %v1842_v56  ;;  %v3383_v51 = vcombine.high %v3373_v50, %v3373_v50  ;;  %v3562_v52 = vmax.f32 %v3359_v25, 0.0 }
 0x217   : > { %v3563_v1 = vmax.f32 %v3373_v50, 0.0  ;;  %v3564_v48 = vmax.f32 %v3381_v18, 0.0  ;;  %v3566_v6 = vmax.f32 %v3366_v36, 0.0  ;;  %v3567_v19 = vmax.f32 %v3380_v58, 0.0 }
 0x218   : > { %v3568_v9 = vmax.f32 %v3382_v61, 0.0  ;;  %v1844_v0 = vrot.slane %v1843_v28, 4  ;;  %v3565_v13 = vmax.f32 %v3383_v51, 0.0  ;;  %v1455_v33 = vrot.slane %v1282_v3, %v5962_v24 }
 0x219   : > { %v4029_v54 = vcombine.low %v3562_v52, %v3563_v1  ;;  %v6390_v14 = vmax.f32 %v1837_v35, %v1838_v39  ;;  %v4031_v27 = vcombine.low %v3566_v6, %v3567_v19  ;;  %v1462_v42 = vrot.slane %v1448_v20, %v5962_v24 }
 0x21a   : > { %v4083_v8 = vrot.slane %v3568_v9, %v5301_v53  ;;  %v1540_v32 = vmax.f32 %v1447_v37, 0.0  ;;  %v4030_v29 = vcombine.low %v3564_v48, %v3565_v13  ;;  %v1463_v31 = vcombine.high %v1455_v33, %v1455_v33 }
 0x21b   : > { %v4045_v34 = vrot.slane %v4029_v54, %v5301_v53  ;;  %v1845_v45 = vmax.f32 %v1843_v28, %v1844_v0  ;;  %v4059_v15 = vrot.slane %v4031_v27, %v5301_v53  ;;  %v1464_v43 = vcombine.high %v1462_v42, %v1462_v42 }
 0x21c   : > { %v6603_v17 = vcombine.low %v6057_v12, %v6060_v47  ;;  %v4052_v39 = vrot.slane %v4030_v29, %v5301_v53  ;;  %v4090_v25 = vrot.slane %v4083_v8, %v5301_v53  ;;  %v1541_v23 = vmax.f32 %v1455_v33, 0.0 }
 0x21d   : > { %v4060_v3 = vcombine.low %v4038_v46, %v4045_v34  ;;  %v3384_v36 = vcombine.high %v3380_v58, %v3380_v58  ;;  %v1542_v37 = vmax.f32 %v1463_v31, 0.0  ;;  %v1543_v59 = vmax.f32 %v1462_v42, 0.0 }
 0x21e   : > { %v2979_v35 = vadd.f32 %v6208_v7, %v6603_v17  ;;  %v1544_v50 = vmax.f32 %v1464_v43, 0.0  ;;  %v4213_v18 = vrot.slane %v6383_v57, 4  ;;  %v4061_v56 = vcombine.low %v4052_v39, %v4059_v15 }
 0x21f   : > { %v4068_v61 = vrot.slane %v4060_v3, %v5301_v53  ;;  %v1753_v20 = vcombine.low %v1540_v32, %v1541_v23  ;;  %v1754_v28 = vcombine.low %v1542_v37, %v1543_v59  ;;  %v1846_v46 = vrot.slane %v1845_v45, 2 }
 0x220   : > { %v1776_v12 = vrot.slane %v1544_v50, %v5962_v24  ;;  %v3385_v47 = vcombine.high %v2979_v35, %v2979_v35  ;;  %v3392_v7 = vrot.slane %v2979_v35, %v5301_v53  ;;  %v4075_v51 = vrot.slane %v4061_v56, %v5301_v53 }
 0x221   : > { %v4219_v58 = vsel %vm4170_vm9, %v4090_v25, -inf  ;;  %v1761_v52 = vrot.slane %v1753_v20, %v5962_v24  ;;  %v1768_v1 = vrot.slane %v1754_v28, %v5962_v24  ;;  %v3569_v19 = vmax.f32 %v3384_v36, 0.0 }
 0x222   : > { %v3399_v48 = vrot.slane %v3385_v47, %v5301_v53  ;;  %v3400_v6 = vcombine.high %v3392_v7, %v3392_v7  ;;  %v4076_v9 = vcombine.low %v4068_v61, %v4075_v51  ;;  %v1850_v0 = vsel %vm1793_vm8, %v1776_v12, -inf }
 0x223   : > { %v3408_v13 = vrot.slane %v3392_v7, %v5301_v53  ;;  %v4476_v54 = vadd.f32 %v6213_v16, %v6065_v10  ;;  %v1769_v33 = vcombine.low %v1761_v52, %v1768_v1  ;;  %v4214_v35 = vmax.f32 %v6383_v57, %v4213_v18 }
 0x224   : > { %v3401_v27 = vcombine.high %v3399_v48, %v3399_v48  ;;  %v3415_v8 = vrot.slane %v3399_v48, %v5301_v53  ;;  %v3422_v42 = vrot.slane %v3400_v6, %v5301_v53  ;;  %v4220_v24 = vmax.f32 %v4076_v9, %v4219_v58 }
 0x225   : > { %v3430_v32 = vcombine.high %v3408_v13, %v3408_v13  ;;  %v3570_v29 = vmax.f32 %v3408_v13, 0.0  ;;  %v4506_v34 = vmax.f32 %v4476_v54, 0.0  ;;  %v1851_v31 = vmax.f32 %v1769_v33, %v1850_v0 }
 0x226   : > { %v3429_v15 = vrot.slane %v3401_v27, %v5301_v53  ;;  %v3431_v43 = vcombine.high %v3415_v8, %v3415_v8  ;;  %v3432_v17 = vcombine.high %v3422_v42, %v3422_v42  ;;  %v4221_v39 = vrot.slane %v4220_v24, 4 }
 0x227   : > { %v3571_v3 = vmax.f32 %v3422_v42, 0.0  ;;  %v3572_v16 = vmax.f32 %v3430_v32, 0.0  ;;  %v3574_v36 = vmax.f32 %v3415_v8, 0.0  ;;  %v1847_v59 = vmax.f32 %v1845_v45, %v1846_v46 }
 0x228   : > { %v3433_v25 = vcombine.high %v3429_v15, %v3429_v15  ;;  %v3573_v23 = vmax.f32 %v3432_v17, 0.0  ;;  %v3575_v37 = vmax.f32 %v3429_v15, 0.0  ;;  %v3576_v50 = vmax.f32 %v3431_v43, 0.0 }
 0x229   : > { %v4091_v56 = vcombine.low %v3569_v19, %v3570_v29  ;;  %v4092_v61 = vcombine.low %v3571_v3, %v3572_v16  ;;  %v1852_v20 = vrot.slane %v1851_v31, 4  ;;  %v4514_v47 = vrot.slane %v4506_v34, 4 }
 0x22a   : > { %v3577_v28 = vmax.f32 %v3433_v25, 0.0  ;;  %v4093_v12 = vcombine.low %v3573_v23, %v3574_v36  ;;  %v4222_v7 = vmax.f32 %v4220_v24, %v4221_v39  ;;  %v4094_v51 = vcombine.low %v3575_v37, %v3576_v50 }
 0x22b   : > { %v4101_v58 = vrot.slane %v4091_v56, %v5301_v53  ;;  %v4108_v57 = vrot.slane %v4092_v61, %v5301_v53  ;;  %v1840_v18 = vrot.slane %v6390_v14, 1  ;;  %v4215_v52 = vrot.slane %v4214_v35, 2 }
 0x22c   : > { %v4115_v1 = vrot.slane %v4093_v12, %v5301_v53  ;;  %v4146_v45 = vrot.slane %v3577_v28, %v5301_v53  ;;  %v4122_v46 = vrot.slane %v4094_v51, %v5301_v53  ;;  %v4515_v6 = vmax.f32 %v4506_v34, %v4514_v47 }
 0x22d   : > { %v4123_v48 = vcombine.low %v4101_v58, %v4108_v57  ;;  %v1867_v19 = vsel %vm1866_vm10, %v6256_v40, %v6243_v38  ;;  %v4209_v9 = vrot.slane %v6367_v21, 1  ;;  %v1848_v0 = vrot.slane %v1847_v59, 1 }
 0x22e   : > { %v1853_v13 = vmax.f32 %v1851_v31, %v1852_v20  ;;  %v4186_v54 = vmax.f32 %v6261_v63, %v4185_v30  ;;  %v1833_v33 = vmax.f32 %v6361_v11, %v1832_v5  ;;  %v4223_v27 = vrot.slane %v4222_v7, 2 }
 0x22f   : > { %v4124_v8 = vcombine.low %v4115_v1, %v4122_v46  ;;  %v4479_v42 = vadd.f32 %v6224_v62, %v6065_v10  ;;  %v6438_v24 = vmax.f32 %v6390_v14, %v1840_v18  ;;  %v6440_v38 = vmax.f32 %v4214_v35, %v4215_v52 }
 0x230   : > { %v4153_v40 = vrot.slane %v4146_v45, %v5301_v53  ;;  %v4243_v32 = vsel %vm1866_vm10, %v4186_v54, %v6251_v60  ;;  %v4131_v63 = vrot.slane %v4123_v48, %v5301_v53  ;;  %v4516_v11 = vrot.slane %v4515_v6, 2  ;;  %v6605_v45 = vld [vmem:[#allocation4_spill] sm:$0xff] }
 0x231   : > { %v4138_v30 = vrot.slane %v4124_v8, %v5301_v53  ;;  %v4507_v5 = vmax.f32 %v4479_v42, 0.0  ;;  %v6447_v29 = vmax.f32 %v1847_v59, %v1848_v0  ;;  %v1854_v34 = vrot.slane %v1853_v13, 2 }
 0x232   : > { %v4484_v62 = vadd.f32 %v6233_v49, %v6065_v10  ;;  %v6451_v14 = vmax.f32 %v4222_v7, %v4223_v27  ;;  %v1869_v60 = vsel %vm1868_vm11, %v6259_v26, %v1867_v19  ;;  %v4227_v43 = vsel %vm4170_vm9, %v4153_v40, -inf }
 0x233   : > { %v4139_v31 = vcombine.low %v4131_v63, %v4138_v30  ;;  %v4520_v15 = vrot.slane %v4507_v5, 4  ;;  %v4500_v53 = vadd.f32 %v6228_v4, %v6065_v10  ;;  %v4244_v17 = vsel %vm1868_vm11, %v6341_v44, %v4243_v32  ;;  %v6604_v44 = vld [vmem:[#allocation12_spill] sm:$0xff] }
 0x234   : > { %v4508_v35 = vmax.f32 %v4484_v62, 0.0  ;;  %v4517_v3 = vmax.f32 %v4515_v6, %v4516_v11  ;;  %v4503_v25 = vadd.f32 %v6235_v2, %v6065_v10  ;;  %v1871_v26 = vsel %vm1870_vm12, %v6329_v22, %v1869_v60 }
 0x235   : > { %v4228_v39 = vmax.f32 %v4139_v31, %v4227_v43  ;;  %v4521_v49 = vmax.f32 %v4507_v5, %v4520_v15  ;;  %v4202_v23 = vmax.f32 %v6349_v55, %v4201_v41  ;;  %v1855_v4 = vmax.f32 %v1853_v13, %v1854_v34  ;;  %v6606_v43 = vld [vmem:[#allocation5_spill] sm:$0xff] }
 0x236   : > { %v4526_v16 = vrot.slane %v4508_v35, 4  ;;  %v4487_v59 = vadd.f32 %v6604_v44, %v6065_v10  ;;  %v4512_v50 = vmax.f32 %v4500_v53, 0.0  ;;  %v4518_v22 = vrot.slane %v4517_v3, 1 }
 0x237   : > { %v4229_v36 = vrot.slane %v4228_v39, 4  ;;  %v4522_v37 = vrot.slane %v4521_v49, 2  ;;  %v4245_v2 = vsel %vm1870_vm12, %v4202_v23, %v4244_v17  ;;  %v4513_v55 = vmax.f32 %v4503_v25, 0.0 }
 0x238   : > { %v4527_v56 = vmax.f32 %v4508_v35, %v4526_v16  ;;  %v4509_v28 = vmax.f32 %v4487_v59, 0.0  ;;  %v1873_v41 = vsel %vm1872_vm13, %v1833_v33, %v1871_v26  ;;  %v4210_v47 = vmax.f32 %v6367_v21, %v4209_v9 }
 0x239   : > { %v4230_v61 = vmax.f32 %v4228_v39, %v4229_v36  ;;  %v4523_v20 = vmax.f32 %v4521_v49, %v4522_v37  ;;  %v1856_v7 = vrot.slane %v1855_v4, 1  ;;  %v4550_v18 = vrot.slane %v4512_v50, 4  ;;  %v306_v49 = vld [vmem:[%s267_s16] sm:$0xff] }
 0x23a   : > { %v4528_v12 = vrot.slane %v4527_v56, 2  ;;  %v4532_v57 = vrot.slane %v4509_v28, 4  ;;  %v4246_v1 = vsel %vm1872_vm13, %v4210_v47, %v4245_v2  ;;  %v4492_v46 = vadd.f32 %v6605_v45, %v6065_v10 }
 0x23b   : > { %v4231_v51 = vrot.slane %v4230_v61, 2  ;;  %v4524_v58 = vrot.slane %v4523_v20, 1  ;;  %v4519_v6 = vmax.f32 %v4517_v3, %v4518_v22  ;;  %v4556_v9 = vrot.slane %v4513_v55, 4 }
 0x23c   : > { %v4529_v52 = vmax.f32 %v4527_v56, %v4528_v12  ;;  %v4533_v0 = vmax.f32 %v4509_v28, %v4532_v57  ;;  %v4510_v13 = vmax.f32 %v4492_v46, 0.0  ;;  %v4225_v54 = vrot.slane %v6451_v14, 1 }
 0x23d   : > { %v4232_v48 = vmax.f32 %v4230_v61, %v4231_v51  ;;  %v4525_v19 = vmax.f32 %v4523_v20, %v4524_v58  ;;  %v1857_v33 = vmax.f32 %v1855_v4, %v1856_v7  ;;  %v4551_v42 = vmax.f32 %v4512_v50, %v4550_v18 }
 0x23e   : > { %v4530_v21 = vrot.slane %v4529_v52, 1  ;;  %v4534_v8 = vrot.slane %v4533_v0, 2  ;;  %v4538_v32 = vrot.slane %v4510_v13, 4  ;;  %v1875_v63 = vsel %vm1874_vm14, %v6438_v24, %v1873_v41 }
 0x23f   : > { %v4570_v27 = vsel %vm1866_vm10, %v4525_v19, %v4519_v6  ;;  %v4233_v30 = vrot.slane %v4232_v48, 1  ;;  %v4557_v34 = vmax.f32 %v4513_v55, %v4556_v9  ;;  %v1877_v31 = vsel %vm1876_vm15, %v6447_v29, %v1875_v63 }
 0x240   : > { %v4531_v40 = vmax.f32 %v4529_v52, %v4530_v21  ;;  %v4535_v11 = vmax.f32 %v4533_v0, %v4534_v8  ;;  %v4539_v62 = vmax.f32 %v4510_v13, %v4538_v32  ;;  %v1879_v60 = vsel %vm1878_vm0, %v1857_v33, %v1877_v31 }
 0x241   : > { %v4217_v24 = vrot.slane %v6440_v38, 1  ;;  %v4495_v53 = vadd.f32 %v6606_v43, %v6065_v10  ;;  %v4226_v17 = vmax.f32 %v6451_v14, %v4225_v54  ;;  %v4234_v39 = vmax.f32 %v4232_v48, %v4233_v30 }
 0x242   : > { %v4571_v5 = vsel %vm1868_vm11, %v4531_v40, %v4570_v27  ;;  %v4536_v15 = vrot.slane %v4535_v11, 1  ;;  %v4540_v35 = vrot.slane %v4539_v62, 2  ;;  %v4552_v26 = vrot.slane %v4551_v42, 2 }
 0x243   : > { %v4218_v16 = vmax.f32 %v6440_v38, %v4217_v24  ;;  %v4511_v25 = vmax.f32 %v4495_v53, 0.0  ;;  %v4558_v29 = vrot.slane %v4557_v34, 2  ;;  %v1881_v59 = vadd.f32 %v1879_v60, %v306_v49 }
 0x244   : > { %v4537_v3 = vmax.f32 %v4535_v11, %v4536_v15  ;;  %v4541_v23 = vmax.f32 %v4539_v62, %v4540_v35  ;;  %v4553_v56 = vmax.f32 %v4551_v42, %v4552_v26 }
 0x245   : > { %v4247_v36 = vsel %vm1874_vm14, %v4218_v16, %v4246_v1  ;;  %v4544_v37 = vrot.slane %v4511_v25, 4  ;;  %v4559_v61 = vmax.f32 %v4557_v34, %v4558_v29 }
 0x246   : > { %v4572_v4 = vsel %vm1870_vm12, %v4537_v3, %v4571_v5  ;;  %v4542_v44 = vrot.slane %v4541_v23, 1  ;;  %v4248_v10 = vsel %vm1876_vm15, %v4226_v17, %v4247_v36  ;;  %v4554_v12 = vrot.slane %v4553_v56, 1 }
 0x247   : > { %v4249_v14 = vsel %vm1878_vm0, %v4234_v39, %v4248_v10  ;;  %v4545_v50 = vmax.f32 %v4511_v25, %v4544_v37  ;;  %v4560_v55 = vrot.slane %v4559_v61, 1 }
 0x248   : > { %v4543_v2 = vmax.f32 %v4541_v23, %v4542_v44  ;;  %v4251_v38 = vadd.f32 %v4249_v14, %v1881_v59  ;;  %v4555_v7 = vmax.f32 %v4553_v56, %v4554_v12 }
 0x249   : > { %v4546_v22 = vrot.slane %v4545_v50, 2  ;;  %v4561_v51 = vmax.f32 %v4559_v61, %v4560_v55 }
 0x24a   : > { %v4573_v20 = vsel %vm1872_vm13, %v4543_v2, %v4572_v4 }
 0x24b   : > { %v4547_v28 = vmax.f32 %v4545_v50, %v4546_v22 }
 0x24d   : > { %v4548_v41 = vrot.slane %v4547_v28, 1 }
 0x24f   : > { %v4549_v47 = vmax.f32 %v4547_v28, %v4548_v41 }
 0x251   : > { %v4574_v58 = vsel %vm1874_vm14, %v4549_v47, %v4573_v20 }
 0x252   : > { %v4575_v57 = vsel %vm1876_vm15, %v4555_v7, %v4574_v58 }
 0x253   : > { %v4576_v18 = vsel %vm1878_vm0, %v4561_v51, %v4575_v57 }
 0x254   : > { %v4578_v52 = vadd.f32 %v4576_v18, %v4251_v38 }
 0x256   : > { %4579 = vst [vmem:[%s271_s19] sm:$0xff] %v4578_v52 }
 0x257 PF: > { %s16_s21 = sadd.s32 1, %s5029_s21  }
 0x258   : > { %p13_p5 = scmp.ge.s32.totalorder %s16_s21, 4  }
 0x25a   :  { %15 = sbr.rel (!%p13_p5) target bundleno = 1 (0x1), region = 77 }

</bundles_post_ra>
